<compile_context>
chip_gen: v7x
topology: tpu7x:2x2x1
jax: 0.10.0
libtpu: 0.0.40
codegen_flags: <defaults>
</compile_context>

<pallas_src>
import functools

import jax
import jax.numpy as jnp
from jax import lax
from jax.experimental import pallas as pl
from jax.experimental.pallas import tpu as pltpu


# ---------------------------------------------------------------------------
# Generation-aware tuning knobs (computed once at import time, outside jit).
# ---------------------------------------------------------------------------
def _detect_tpu():
    gen, vmem_cap = 0, None
    try:
        info = pltpu.get_tpu_info()
        vmem_cap = getattr(info, "vmem_capacity_bytes", None)
    except Exception:
        vmem_cap = None
    kind = ""
    try:
        kind = jax.devices()[0].device_kind.lower()
    except Exception:
        pass
    for g in (7, 6, 5, 4):
        if ("v%d" % g) in kind or ("%dx" % g) in kind:
            gen = g
            break
    return gen, vmem_cap


_GEN, _VMEM_CAP = _detect_tpu()
_NUM_TC = 2 if _GEN >= 7 else 1                 # v7x: 2 TensorCores per chip
if _GEN >= 7:
    _VMEM_LIMIT = 40 << 20                      # 64 MiB physical per TC
elif _GEN in (5, 6):
    _VMEM_LIMIT = 64 << 20                      # 128 MiB physical
else:
    _VMEM_LIMIT = None                          # unknown chip: leave default
if _VMEM_CAP:
    _cap = int(_VMEM_CAP) * 5 // 8
    _VMEM_LIMIT = _cap if _VMEM_LIMIT is None else min(_VMEM_LIMIT, _cap)
_TILE_BUDGET = (_VMEM_LIMIT or (16 << 20)) // 2  # headroom for compiler scratch
_CORE_PARALLEL = getattr(pltpu, "CORE_PARALLEL", None)


def _round_up(x, m):
    return (x + m - 1) // m * m


# ---------------------------------------------------------------------------
# Static tiling plan shared by the one-time weight prep and the forward pass.
# ---------------------------------------------------------------------------
def _matmul_plan(M, K, N, out_dtype):
    out_sz = jnp.dtype(out_dtype).itemsize
    Mp = _round_up(M, 8)
    Np = _round_up(N, 128)

    # TM: biggest mult-of-8 divisor of Mp (<=256).  Split M into multiple blocks
    # only on multi-TC chips (v7x), where the M axis is sharded CORE_PARALLEL;
    # on single-TC v5e/v6e a split is pure per-step overhead.
    cands = [t for t in range(8, min(Mp, 256) + 1, 8) if Mp % t == 0]
    TM = cands[-1] if cands else Mp
    if _NUM_TC > 1 and Mp // TM < _NUM_TC:
        multi = [t for t in cands if Mp // t >= _NUM_TC]
        if multi:
            TM = multi[-1]

    # TN: biggest 128-multiple divisor of Np, capped at 512 (>=256 fills the
    # 256-wide MXU on v6e/v7x when the channel count allows).
    TN = 128
    t = 256
    while t <= min(Np, 512):
        if Np % t == 0:
            TN = t
        t += 128

    # TK: prefer one full-K block (no accumulator round trip, K only padded to
    # the bf16 sublane pack of 16); otherwise tile K in 128-multiples.  The
    # budget counts double-buffered bf16 A/B, double-buffered output, the f32
    # accumulator (multi-K only) and the bias/alpha rows.
    def fits(tk, nk):
        a = 2 * TM * tk * 2
        b = 2 * tk * TN * 2
        o = 2 * TM * TN * out_sz
        acc = TM * TN * 4 if nk > 1 else 0
        misc = 2 * 2 * TN * 4
        return a + b + o + acc + misc <= _TILE_BUDGET

    Kp1 = _round_up(K, 16)
    if fits(Kp1, 1):
        Kp, TK, n_k = Kp1, Kp1, 1
    else:
        TK = 128
        t = 256
        while t <= 4096:
            if fits(t, 2):
                TK = t
            t += 128
        Kp = _round_up(K, TK)
        n_k = Kp // TK
    return dict(Mp=Mp, Kp=Kp, Np=Np, TM=TM, TK=TK, TN=TN, n_k=n_k)


# ---------------------------------------------------------------------------
# Pallas kernel 1: tiled matmul (bf16 operands, f32 accumulate) + bias +
# per-output-column PReLU (alpha == 1.0 -> identity, i.e. "no activation").
# ---------------------------------------------------------------------------
def _epilogue(acc, bias, alpha, out_dtype):
    y = acc + bias                                   # f32 epilogue (v5e-safe)
    return jnp.where(y >= 0.0, y, y * alpha).astype(out_dtype)


def _mm_single_kernel(a_ref, b_ref, bias_ref, alpha_ref, o_ref):
    # n_k == 1: no accumulator scratch, no init conditional.
    y = jnp.dot(a_ref[...], b_ref[...], preferred_element_type=jnp.float32)
    o_ref[...] = _epilogue(y, bias_ref[...], alpha_ref[...], o_ref.dtype)


def _mm_multi_kernel(a_ref, b_ref, bias_ref, alpha_ref, o_ref, acc_ref, *, n_k):
    @pl.when(pl.program_id(2) == 0)
    def _():
        acc_ref[...] = jnp.zeros_like(acc_ref)

    acc_ref[...] += jnp.dot(a_ref[...], b_ref[...],
                            preferred_element_type=jnp.float32)

    @pl.when(pl.program_id(2) == n_k - 1)
    def _():
        o_ref[...] = _epilogue(acc_ref[...], bias_ref[...], alpha_ref[...],
                               o_ref.dtype)


def matmul_bias_prelu(a, b_p, bias_p, alpha_p, plan, out_dtype=jnp.float32):
    """(M,K) @ pre-padded (Kp,Np) bf16 weights + bias[Np], per-column PReLU."""
    M, K = a.shape
    Mp, Kp, Np = plan["Mp"], plan["Kp"], plan["Np"]
    TM, TK, TN, n_k = plan["TM"], plan["TK"], plan["TN"], plan["n_k"]

    a = a.astype(jnp.bfloat16)
    if (Mp, Kp) != (M, K):
        a = jnp.pad(a, ((0, Mp - M), (0, Kp - K)))

    m_blocks, n_blocks = Mp // TM, Np // TN
    if _GEN >= 7 and _CORE_PARALLEL is not None and m_blocks >= _NUM_TC:
        sem = (_CORE_PARALLEL, pltpu.PARALLEL, pltpu.ARBITRARY)
    else:
        sem = ("parallel", "parallel", "arbitrary")

    cost = pl.CostEstimate(
        flops=2 * Mp * Np * Kp,
        transcendentals=0,
        bytes_accessed=2 * Mp * Kp + 2 * Kp * Np
        + jnp.dtype(out_dtype).itemsize * Mp * Np + 8 * Np)

    if n_k == 1:
        out = pl.pallas_call(
            _mm_single_kernel,
            out_shape=jax.ShapeDtypeStruct((Mp, Np), out_dtype),
            grid_spec=pltpu.PrefetchScalarGridSpec(
                num_scalar_prefetch=0,
                grid=(m_blocks, n_blocks),
                in_specs=[
                    pl.BlockSpec((TM, Kp), lambda i, j: (i, 0)),
                    pl.BlockSpec((Kp, TN), lambda i, j: (0, j)),
                    pl.BlockSpec((1, TN), lambda i, j: (0, j)),
                    pl.BlockSpec((1, TN), lambda i, j: (0, j)),
                ],
                out_specs=pl.BlockSpec((TM, TN), lambda i, j: (i, j)),
            ),
            compiler_params=pltpu.CompilerParams(
                dimension_semantics=sem[:2], vmem_limit_bytes=_VMEM_LIMIT),
            cost_estimate=cost,
        )(a, b_p, bias_p, alpha_p)
    else:
        if n_k >= 3:
            # A tiles re-stream every k step; extra buffering hides HBM latency.
            a_spec = pl.BlockSpec((TM, TK), lambda i, j, k: (i, k),
                                  pipeline_mode=pl.Buffered(3))
        else:
            a_spec = pl.BlockSpec((TM, TK), lambda i, j, k: (i, k))
        out = pl.pallas_call(
            functools.partial(_mm_multi_kernel, n_k=n_k),
            out_shape=jax.ShapeDtypeStruct((Mp, Np), out_dtype),
            grid_spec=pltpu.PrefetchScalarGridSpec(
                num_scalar_prefetch=0,
                grid=(m_blocks, n_blocks, n_k),
                in_specs=[
                    a_spec,
                    pl.BlockSpec((TK, TN), lambda i, j, k: (k, j)),
                    pl.BlockSpec((1, TN), lambda i, j, k: (0, j)),
                    pl.BlockSpec((1, TN), lambda i, j, k: (0, j)),
                ],
                out_specs=pl.BlockSpec((TM, TN), lambda i, j, k: (i, j)),
                scratch_shapes=[pltpu.VMEM((TM, TN), jnp.float32)],
            ),
            compiler_params=pltpu.CompilerParams(
                dimension_semantics=sem, vmem_limit_bytes=_VMEM_LIMIT),
            cost_estimate=cost,
        )(a, b_p, bias_p, alpha_p)
    if Mp != M:
        out = out[:M]
    return out


# ---------------------------------------------------------------------------
# Pallas kernel 2: fused SE-gated residual + PReLU:  out = prelu(h * gate + y).
# gate is (B, C), alpha is (C,) -- broadcast in-kernel over a lane-dense slab.
# ---------------------------------------------------------------------------
def _se_residual_kernel(h_ref, y_ref, g_ref, a_ref, o_ref):
    v = (h_ref[...].astype(jnp.float32) * g_ref[...]
         + y_ref[...].astype(jnp.float32))
    o_ref[...] = jnp.where(v >= 0.0, v, v * a_ref[...]).astype(o_ref.dtype)


def se_residual_prelu(h, y, gate, alpha):
    B, Ho, Wo, C = h.shape
    S = Ho * Wo

    # Fold spatial positions into the lane axis so the last dim is a 128
    # multiple (unmasked vector stores).
    if C % 128 == 0:
        rep = 1
    else:
        rep = None
        r = 2
        while r * C <= 1024:
            if (r * C) % 128 == 0 and S % r == 0:
                rep = r
                break
            r += 1

    if rep is not None:
        Cp, L = C, rep * C
        h3 = h.reshape(B, S // rep, L)
        y3 = y.reshape(B, S // rep, L)
        g2 = jnp.tile(gate.astype(jnp.float32), (1, rep)).reshape(B, 1, L)
        a2 = jnp.tile(alpha.astype(jnp.float32), rep).reshape(1, 1, L)
    else:
        # Channel count not foldable to a 128 multiple: pad channels up to 128
        # so stores stay lane-dense instead of masked (perf, not correctness).
        Cp = _round_up(C, 128)
        L, rep = Cp, 1
        pad4 = ((0, 0), (0, 0), (0, 0), (0, Cp - C))
        h3 = jnp.pad(h, pad4).reshape(B, S, L)
        y3 = jnp.pad(y, pad4).reshape(B, S, L)
        g2 = jnp.pad(gate.astype(jnp.float32),
                     ((0, 0), (0, Cp - C))).reshape(B, 1, L)
        a2 = jnp.pad(alpha.astype(jnp.float32), ((0, Cp - C),),
                     constant_values=1.0).reshape(1, 1, L)

    R = S // rep
    # Whole slab in one grid step when small; otherwise mult-of-8 row blocks.
    budget = 2 << 20
    TR = R
    if B * R * L * 4 > budget:
        cands = [t for t in range(8, R, 8)
                 if R % t == 0 and B * t * L * 4 <= budget]
        if cands:
            TR = cands[-1]

    out = pl.pallas_call(
        _se_residual_kernel,
        out_shape=jax.ShapeDtypeStruct((B, R, L), jnp.float32),
        grid_spec=pltpu.PrefetchScalarGridSpec(
            num_scalar_prefetch=0,
            grid=(R // TR,),
            in_specs=[
                pl.BlockSpec((B, TR, L), lambda r: (0, r, 0)),
                pl.BlockSpec((B, TR, L), lambda r: (0, r, 0)),
                pl.BlockSpec((B, 1, L), lambda r: (0, 0, 0)),
                pl.BlockSpec((1, 1, L), lambda r: (0, 0, 0)),
            ],
            out_specs=pl.BlockSpec((B, TR, L), lambda r: (0, r, 0)),
        ),
        compiler_params=pltpu.CompilerParams(
            dimension_semantics=("arbitrary",), vmem_limit_bytes=_VMEM_LIMIT),
    )(h3, y3, g2, a2)

    if Cp == C:
        return out.reshape(B, Ho, Wo, C)
    return out.reshape(B, S, Cp)[..., :C].reshape(B, Ho, Wo, C)


# ---------------------------------------------------------------------------
# im2col glue (JAX, kept in bf16); all FLOPs go through the Pallas matmul.
# TODO(synk): fold the 9 taps into the matmul K grid axis to avoid the 9x
# activation re-read instead of materializing patches.
# ---------------------------------------------------------------------------
def _im2col(x, kh, kw, stride, pad):
    B, H, W, Cin = x.shape
    xp = jnp.pad(x, ((0, 0), (pad, pad), (pad, pad), (0, 0)))
    Ho = (H + 2 * pad - kh) // stride + 1
    Wo = (W + 2 * pad - kw) // stride + 1
    cols = []
    for dy in range(kh):
        for dx in range(kw):
            cols.append(xp[:, dy:dy + stride * Ho:stride,
                           dx:dx + stride * Wo:stride, :])
    patches = jnp.concatenate(cols, axis=-1)          # (B, Ho, Wo, kh*kw*Cin)
    return patches.reshape(B * Ho * Wo, kh * kw * Cin), Ho, Wo


# ---------------------------------------------------------------------------
# One-time parameter prep (padded bf16 weight slabs, f32 bias/alpha rows) +
# jitted forward closure.  Matches the PyTorch ResBlock semantics.
# ---------------------------------------------------------------------------
def build_res_block_forward(params, in_shape, stride=2):
    B, Cin, H, W = in_shape
    Cout = params["conv1_w"].shape[-1]
    Ho = (H + 2 - 3) // stride + 1
    Wo = (W + 2 - 3) // stride + 1
    M = B * Ho * Wo
    has_conv0 = "conv0_w" in params
    Cb = _round_up(Cout, 128)           # lane-aligned start of the main branch

    # conv0 (skip, no bias/act) and conv1 (bias + PReLU) share im2col patches ->
    # fuse into one matmul; each branch padded to a 128-aligned column block so
    # N = 2*Cb fills the 256-wide MXU and the output slices are lane-aligned.
    K1 = 9 * Cin
    N1 = 2 * Cb if has_conv0 else Cout
    plan1 = _matmul_plan(M, K1, N1, jnp.bfloat16)
    main0 = Cb if has_conv0 else 0
    w1 = jnp.zeros((plan1["Kp"], plan1["Np"]), jnp.float32)
    if has_conv0:
        w1 = w1.at[:K1, :Cout].set(params["conv0_w"].reshape(K1, Cout))
    w1 = w1.at[:K1, main0:main0 + Cout].set(params["conv1_w"].reshape(K1, Cout))
    bias1 = jnp.zeros((1, plan1["Np"]), jnp.float32)
    bias1 = bias1.at[0, main0:main0 + Cout].set(params["conv1_b"])
    alpha1 = jnp.ones((1, plan1["Np"]), jnp.float32)   # 1.0 -> identity (skip/pad)
    alpha1 = alpha1.at[0, main0:main0 + Cout].set(params["conv1_alpha"])
    w1_p = w1.astype(jnp.bfloat16)

    # conv2: bias, no activation (alpha = 1 everywhere).
    K2 = 9 * Cout
    plan2 = _matmul_plan(M, K2, Cout, jnp.float32)
    w2 = jnp.zeros((plan2["Kp"], plan2["Np"]), jnp.float32)
    w2 = w2.at[:K2, :Cout].set(params["conv2_w"].reshape(K2, Cout))
    bias2 = jnp.zeros((1, plan2["Np"]), jnp.float32).at[0, :Cout].set(
        params["conv2_b"])
    alpha2 = jnp.ones((1, plan2["Np"]), jnp.float32)
    w2_p = w2.astype(jnp.bfloat16)

    fc1_w, fc2_w = params["fc1_w"], params["fc2_w"]
    relu1_alpha, relu2_alpha = params["relu1_alpha"], params["relu2_alpha"]

    def fwd(x_nchw):
        x_nhwc = jnp.transpose(x_nchw, (0, 2, 3, 1))          # NCHW -> NHWC
        x = x_nhwc.astype(jnp.bfloat16)

        patches, _, _ = _im2col(x, 3, 3, stride, 1)           # bf16 patches
        yz = matmul_bias_prelu(patches, w1_p, bias1, alpha1, plan1,
                               out_dtype=jnp.bfloat16)
        if has_conv0:
            y_skip = yz[:, :Cout]                             # conv0(x)
            h = yz[:, main0:main0 + Cout]                     # PReLU(conv1(x))
        else:                                                 # nn.Identity skip
            y_skip = x_nhwc.reshape(M, Cout)
            h = yz[:, :Cout]
        h = h.reshape(B, Ho, Wo, Cout)

        patches2, _, _ = _im2col(h, 3, 3, 1, 1)               # bf16 patches
        h2 = matmul_bias_prelu(patches2, w2_p, bias2, alpha2, plan2,
                               out_dtype=jnp.float32)[:, :Cout]
        h2 = h2.reshape(B, Ho, Wo, Cout)

        # Squeeze-excite gate: global mean + two tiny FCs (M = B) in plain JAX;
        # padding them to MXU tiles would be >99% wasted work.
        m = jnp.mean(h2, axis=(1, 2))                         # (B, Cout)
        t = m @ fc1_w
        t = jnp.where(t >= 0.0, t, t * relu1_alpha)           # PReLU(1)
        gate = jax.nn.sigmoid(t @ fc2_w)                      # (B, Cout)

        out = se_residual_prelu(h2, y_skip.reshape(B, Ho, Wo, Cout), gate,
                                relu2_alpha)
        return jnp.transpose(out, (0, 3, 1, 2))               # NHWC -> NCHW

    return jax.jit(fwd)


# ---------------------------------------------------------------------------
# Pure-JAX f32 reference (independent of the Pallas path).
# ---------------------------------------------------------------------------
def res_block_ref(params, x_nchw, *, stride=2):
    x = jnp.transpose(x_nchw, (0, 2, 3, 1))
    dn = ("NHWC", "HWIO", "NHWC")
    cv = lambda v, w, s: lax.conv_general_dilated(
        v, w, (s, s), ((1, 1), (1, 1)), dimension_numbers=dn)
    y = cv(x, params["conv0_w"], stride) if "conv0_w" in params else x
    h = cv(x, params["conv1_w"], stride) + params["conv1_b"]
    h = jnp.where(h >= 0.0, h, h * params["conv1_alpha"])
    h = cv(h, params["conv2_w"], 1) + params["conv2_b"]
    m = jnp.mean(h, axis=(1, 2))
    t = m @ params["fc1_w"]
    t = jnp.where(t >= 0.0, t, t * params["relu1_alpha"])
    g = jax.nn.sigmoid(t @ params["fc2_w"])
    v = h * g[:, None, None, :] + y
    out = jnp.where(v >= 0.0, v, v * params["relu2_alpha"])
    return jnp.transpose(out, (0, 3, 1, 2))


# ---------------------------------------------------------------------------
# Deterministic parameter construction (shapes follow ResBlock.__init__).
# ---------------------------------------------------------------------------
def make_resblock_params(key, cin, cout, stride=2):
    ks = jax.random.split(key, 7)

    def init(k, shape, fan_in):
        return jax.random.normal(k, shape, jnp.float32) / jnp.sqrt(float(fan_in))

    p = {
        "conv1_w": init(ks[0], (3, 3, cin, cout), 9 * cin),
        "conv1_b": init(ks[1], (cout,), cin) * 0.1,
        "conv1_alpha": jnp.full((cout,), 0.25, jnp.float32),
        "conv2_w": init(ks[2], (3, 3, cout, cout), 9 * cout),
        "conv2_b": init(ks[3], (cout,), cout) * 0.1,
        "relu1_alpha": jnp.float32(0.25),
        "relu2_alpha": jnp.full((cout,), 0.25, jnp.float32),
        "fc1_w": init(ks[4], (cout, 16), cout),
        "fc2_w": init(ks[5], (16, cout), 16),
    }
    if not (cin == cout and stride == 1):
        p["conv0_w"] = init(ks[6], (3, 3, cin, cout), 9 * cin)
    return p


if __name__ == "__main__":
    key = jax.random.PRNGKey(0)
    kp, kx = jax.random.split(key)
    B, Cin, Cout, H, W, stride = 2, 32, 64, 16, 16, 2
    params = make_resblock_params(kp, Cin, Cout, stride)
    x = jax.random.normal(kx, (B, Cin, H, W), jnp.float32)

    fwd = build_res_block_forward(params, (B, Cin, H, W), stride=stride)
    out = fwd(x)
    jax.block_until_ready(out)
    assert out.shape == (B, Cout, H // stride, W // stride)

    ref = res_block_ref(params, x, stride=stride)
    # Operands are intentionally bf16 on the MXU (f32 accumulate), so compare
    # with a bf16-appropriate tolerance against the f32 reference.
    err = float(jnp.max(jnp.abs(out - ref)))
    scale = float(jnp.max(jnp.abs(ref))) + 1e-6
    assert err < 1e-2 + 0.1 * scale, f"mismatch: err={err} scale={scale}"
    print("KERNEL_OK")
</pallas_src>

<mosaic_0001>
module attributes {stable_mosaic.version = 11 : i64} {
  func.func @_mm_single_kernel(%arg0: i32, %arg1: i32, %arg2: memref<128x288xbf16, #tpu.memory_space<vmem>>, %arg3: memref<288x256xbf16, #tpu.memory_space<vmem>>, %arg4: memref<1x256xf32, #tpu.memory_space<vmem>>, %arg5: memref<1x256xf32, #tpu.memory_space<vmem>>, %arg6: memref<128x256xbf16, #tpu.memory_space<vmem>>) attributes {dimension_semantics = [#tpu.dimension_semantics<parallel>, #tpu.dimension_semantics<parallel>], iteration_bounds = array<i64: 1, 1>, scalar_prefetch = 0 : i64, scratch_operands = 0 : i64, tpu.core_type = #tpu.core_type<tc>, window_params = [{transform_indices = @transform_0, window_bounds = array<i64: 128, 288>}, {transform_indices = @transform_1, window_bounds = array<i64: 288, 256>}, {transform_indices = @transform_2, window_bounds = array<i64: 1, 256>}, {transform_indices = @transform_3, window_bounds = array<i64: 1, 256>}, {transform_indices = @transform_4, window_bounds = array<i64: 128, 256>}]} {
    %c0 = arith.constant 0 : index
    %c0_0 = arith.constant 0 : index
    %0 = vector.load %arg2[%c0, %c0_0] : memref<128x288xbf16, #tpu.memory_space<vmem>>, vector<128x288xbf16>
    %c0_1 = arith.constant 0 : index
    %c0_2 = arith.constant 0 : index
    %1 = vector.load %arg3[%c0_1, %c0_2] : memref<288x256xbf16, #tpu.memory_space<vmem>>, vector<288x256xbf16>
    %cst = arith.constant dense<0.000000e+00> : vector<128x256xf32>
    %2 = tpu.matmul %0, %1, %cst {dimension_numbers = #tpu.dot_dimension_numbers<[1], [0], [0], [1], [0, 0, 1, 1], [], []>} : vector<128x288xbf16>, vector<288x256xbf16>, vector<128x256xf32> -> vector<128x256xf32>
    %c0_3 = arith.constant 0 : index
    %c0_4 = arith.constant 0 : index
    %3 = vector.load %arg4[%c0_3, %c0_4] : memref<1x256xf32, #tpu.memory_space<vmem>>, vector<1x256xf32>
    %c0_5 = arith.constant 0 : index
    %c0_6 = arith.constant 0 : index
    %4 = vector.load %arg5[%c0_5, %c0_6] : memref<1x256xf32, #tpu.memory_space<vmem>>, vector<1x256xf32>
    %5 = vector.broadcast %3 : vector<1x256xf32> to vector<128x256xf32>
    %6 = arith.addf %2, %5 : vector<128x256xf32>
    %cst_7 = arith.constant 0.000000e+00 : f32
    %7 = vector.broadcast %cst_7 : f32 to vector<128x256xf32>
    %8 = arith.cmpf oge, %6, %7 : vector<128x256xf32>
    %9 = vector.broadcast %4 : vector<1x256xf32> to vector<128x256xf32>
    %10 = arith.mulf %6, %9 : vector<128x256xf32>
    %11 = arith.select %8, %6, %10 : vector<128x256xi1>, vector<128x256xf32>
    %12 = arith.truncf %11 : vector<128x256xf32> to vector<128x256xbf16>
    %c0_8 = arith.constant 0 : index
    %c0_9 = arith.constant 0 : index
    %13 = vector.load %arg6[%c0_8, %c0_9] : memref<128x256xbf16, #tpu.memory_space<vmem>>, vector<128x256xbf16>
    tpu.vector_store %arg6[%c0_8, %c0_9], %12 {strides = array<i32>} : memref<128x256xbf16, #tpu.memory_space<vmem>>, vector<128x256xbf16>,
    return
  }
  func.func @transform_0(%arg0: i32, %arg1: i32) -> (i32, i32) {
    %c0_i32 = arith.constant 0 : i32
    %c0_i32_0 = arith.constant 0 : i32
    return %arg0, %c0_i32 : i32, i32
  }
  func.func @transform_1(%arg0: i32, %arg1: i32) -> (i32, i32) {
    %c0_i32 = arith.constant 0 : i32
    %c0_i32_0 = arith.constant 0 : i32
    return %c0_i32, %arg1 : i32, i32
  }
  func.func @transform_2(%arg0: i32, %arg1: i32) -> (i32, i32) {
    %c0_i32 = arith.constant 0 : i32
    %c0_i32_0 = arith.constant 0 : i32
    return %c0_i32, %arg1 : i32, i32
  }
  func.func @transform_3(%arg0: i32, %arg1: i32) -> (i32, i32) {
    %c0_i32 = arith.constant 0 : i32
    %c0_i32_0 = arith.constant 0 : i32
    return %c0_i32, %arg1 : i32, i32
  }
  func.func @transform_4(%arg0: i32, %arg1: i32) -> (i32, i32) {
    %c0_i32 = arith.constant 0 : i32
    return %arg0, %arg1 : i32, i32
  }
}

module attributes {stable_mosaic.version = 11 : i64} {
  func.func @_mm_single_kernel(%arg0: i32, %arg1: i32, %arg2: memref<128x576xbf16, #tpu.memory_space<vmem>>, %arg3: memref<576x128xbf16, #tpu.memory_space<vmem>>, %arg4: memref<1x128xf32, #tpu.memory_space<vmem>>, %arg5: memref<1x128xf32, #tpu.memory_space<vmem>>, %arg6: memref<128x128xf32, #tpu.memory_space<vmem>>) attributes {dimension_semantics = [#tpu.dimension_semantics<parallel>, #tpu.dimension_semantics<parallel>], iteration_bounds = array<i64: 1, 1>, scalar_prefetch = 0 : i64, scratch_operands = 0 : i64, tpu.core_type = #tpu.core_type<tc>, window_params = [{transform_indices = @transform_0, window_bounds = array<i64: 128, 576>}, {transform_indices = @transform_1, window_bounds = array<i64: 576, 128>}, {transform_indices = @transform_2, window_bounds = array<i64: 1, 128>}, {transform_indices = @transform_3, window_bounds = array<i64: 1, 128>}, {transform_indices = @transform_4, window_bounds = array<i64: 128, 128>}]} {
    %c0 = arith.constant 0 : index
    %c0_0 = arith.constant 0 : index
    %0 = vector.load %arg2[%c0, %c0_0] : memref<128x576xbf16, #tpu.memory_space<vmem>>, vector<128x576xbf16>
    %c0_1 = arith.constant 0 : index
    %c0_2 = arith.constant 0 : index
    %1 = vector.load %arg3[%c0_1, %c0_2] : memref<576x128xbf16, #tpu.memory_space<vmem>>, vector<576x128xbf16>
    %cst = arith.constant dense<0.000000e+00> : vector<128x128xf32>
    %2 = tpu.matmul %0, %1, %cst {dimension_numbers = #tpu.dot_dimension_numbers<[1], [0], [0], [1], [0, 0, 1, 1], [], []>} : vector<128x576xbf16>, vector<576x128xbf16>, vector<128x128xf32> -> vector<128x128xf32>
    %c0_3 = arith.constant 0 : index
    %c0_4 = arith.constant 0 : index
    %3 = vector.load %arg4[%c0_3, %c0_4] : memref<1x128xf32, #tpu.memory_space<vmem>>, vector<1x128xf32>
    %c0_5 = arith.constant 0 : index
    %c0_6 = arith.constant 0 : index
    %4 = vector.load %arg5[%c0_5, %c0_6] : memref<1x128xf32, #tpu.memory_space<vmem>>, vector<1x128xf32>
    %5 = vector.broadcast %3 : vector<1x128xf32> to vector<128x128xf32>
    %6 = arith.addf %2, %5 : vector<128x128xf32>
    %cst_7 = arith.constant 0.000000e+00 : f32
    %7 = vector.broadcast %cst_7 : f32 to vector<128x128xf32>
    %8 = arith.cmpf oge, %6, %7 : vector<128x128xf32>
    %9 = vector.broadcast %4 : vector<1x128xf32> to vector<128x128xf32>
    %10 = arith.mulf %6, %9 : vector<128x128xf32>
    %11 = arith.select %8, %6, %10 : vector<128x128xi1>, vector<128x128xf32>
    %c0_8 = arith.constant 0 : index
    %c0_9 = arith.constant 0 : index
    %12 = vector.load %arg6[%c0_8, %c0_9] : memref<128x128xf32, #tpu.memory_space<vmem>>, vector<128x128xf32>
    tpu.vector_store %arg6[%c0_8, %c0_9], %11 {strides = array<i32>} : memref<128x128xf32, #tpu.memory_space<vmem>>, vector<128x128xf32>,
    return
  }
  func.func @transform_0(%arg0: i32, %arg1: i32) -> (i32, i32) {
    %c0_i32 = arith.constant 0 : i32
    %c0_i32_0 = arith.constant 0 : i32
    return %arg0, %c0_i32 : i32, i32
  }
  func.func @transform_1(%arg0: i32, %arg1: i32) -> (i32, i32) {
    %c0_i32 = arith.constant 0 : i32
    %c0_i32_0 = arith.constant 0 : i32
    return %c0_i32, %arg1 : i32, i32
  }
  func.func @transform_2(%arg0: i32, %arg1: i32) -> (i32, i32) {
    %c0_i32 = arith.constant 0 : i32
    %c0_i32_0 = arith.constant 0 : i32
    return %c0_i32, %arg1 : i32, i32
  }
  func.func @transform_3(%arg0: i32, %arg1: i32) -> (i32, i32) {
    %c0_i32 = arith.constant 0 : i32
    %c0_i32_0 = arith.constant 0 : i32
    return %c0_i32, %arg1 : i32, i32
  }
  func.func @transform_4(%arg0: i32, %arg1: i32) -> (i32, i32) {
    %c0_i32 = arith.constant 0 : i32
    return %arg0, %arg1 : i32, i32
  }
}

module attributes {stable_mosaic.version = 11 : i64} {
  func.func @_se_residual_kernel(%arg0: i32, %arg1: memref<2x32x128xf32, #tpu.memory_space<vmem>>, %arg2: memref<2x32x128xbf16, #tpu.memory_space<vmem>>, %arg3: memref<2x1x128xf32, #tpu.memory_space<vmem>>, %arg4: memref<1x1x128xf32, #tpu.memory_space<vmem>>, %arg5: memref<2x32x128xf32, #tpu.memory_space<vmem>>) attributes {dimension_semantics = [#tpu.dimension_semantics<arbitrary>], iteration_bounds = array<i64: 1>, scalar_prefetch = 0 : i64, scratch_operands = 0 : i64, tpu.core_type = #tpu.core_type<tc>, window_params = [{transform_indices = @transform_0, window_bounds = array<i64: 2, 32, 128>}, {transform_indices = @transform_1, window_bounds = array<i64: 2, 32, 128>}, {pipeline_mode = #tpu.pipeline_mode<synchronous>, transform_indices = @transform_2, window_bounds = array<i64: 2, 1, 128>}, {pipeline_mode = #tpu.pipeline_mode<synchronous>, transform_indices = @transform_3, window_bounds = array<i64: 1, 1, 128>}, {transform_indices = @transform_4, window_bounds = array<i64: 2, 32, 128>}]} {
    %c0 = arith.constant 0 : index
    %c0_0 = arith.constant 0 : index
    %c0_1 = arith.constant 0 : index
    %0 = vector.load %arg1[%c0, %c0_0, %c0_1] : memref<2x32x128xf32, #tpu.memory_space<vmem>>, vector<2x32x128xf32>
    %c0_2 = arith.constant 0 : index
    %c0_3 = arith.constant 0 : index
    %c0_4 = arith.constant 0 : index
    %1 = vector.load %arg3[%c0_2, %c0_3, %c0_4] : memref<2x1x128xf32, #tpu.memory_space<vmem>>, vector<2x1x128xf32>
    %2 = vector.broadcast %1 : vector<2x1x128xf32> to vector<2x32x128xf32>
    %3 = arith.mulf %0, %2 : vector<2x32x128xf32>
    %c0_5 = arith.constant 0 : index
    %c0_6 = arith.constant 0 : index
    %c0_7 = arith.constant 0 : index
    %4 = vector.load %arg2[%c0_5, %c0_6, %c0_7] : memref<2x32x128xbf16, #tpu.memory_space<vmem>>, vector<2x32x128xbf16>
    %5 = arith.extf %4 : vector<2x32x128xbf16> to vector<2x32x128xf32>
    %6 = arith.addf %3, %5 : vector<2x32x128xf32>
    %cst = arith.constant 0.000000e+00 : f32
    %7 = vector.broadcast %cst : f32 to vector<2x32x128xf32>
    %8 = arith.cmpf oge, %6, %7 : vector<2x32x128xf32>
    %c0_8 = arith.constant 0 : index
    %c0_9 = arith.constant 0 : index
    %c0_10 = arith.constant 0 : index
    %9 = vector.load %arg4[%c0_8, %c0_9, %c0_10] : memref<1x1x128xf32, #tpu.memory_space<vmem>>, vector<1x1x128xf32>
    %10 = vector.broadcast %9 : vector<1x1x128xf32> to vector<2x32x128xf32>
    %11 = arith.mulf %6, %10 : vector<2x32x128xf32>
    %12 = arith.select %8, %6, %11 : vector<2x32x128xi1>, vector<2x32x128xf32>
    %c0_11 = arith.constant 0 : index
    %c0_12 = arith.constant 0 : index
    %c0_13 = arith.constant 0 : index
    %13 = vector.load %arg5[%c0_11, %c0_12, %c0_13] : memref<2x32x128xf32, #tpu.memory_space<vmem>>, vector<2x32x128xf32>
    tpu.vector_store %arg5[%c0_11, %c0_12, %c0_13], %12 {strides = array<i32>} : memref<2x32x128xf32, #tpu.memory_space<vmem>>, vector<2x32x128xf32>,
    return
  }
  func.func @transform_0(%arg0: i32) -> (i32, i32, i32) {
    %c0_i32 = arith.constant 0 : i32
    %c0_i32_0 = arith.constant 0 : i32
    %c0_i32_1 = arith.constant 0 : i32
    return %c0_i32, %arg0, %c0_i32_0 : i32, i32, i32
  }
  func.func @transform_1(%arg0: i32) -> (i32, i32, i32) {
    %c0_i32 = arith.constant 0 : i32
    %c0_i32_0 = arith.constant 0 : i32
    %c0_i32_1 = arith.constant 0 : i32
    return %c0_i32, %arg0, %c0_i32_0 : i32, i32, i32
  }
  func.func @transform_2(%arg0: i32) -> (i32, i32, i32) {
    %c0_i32 = arith.constant 0 : i32
    %c0_i32_0 = arith.constant 0 : i32
    %c0_i32_1 = arith.constant 0 : i32
    %c0_i32_2 = arith.constant 0 : i32
    return %c0_i32, %c0_i32_0, %c0_i32_1 : i32, i32, i32
  }
  func.func @transform_3(%arg0: i32) -> (i32, i32, i32) {
    %c0_i32 = arith.constant 0 : i32
    %c0_i32_0 = arith.constant 0 : i32
    %c0_i32_1 = arith.constant 0 : i32
    %c0_i32_2 = arith.constant 0 : i32
    return %c0_i32, %c0_i32_0, %c0_i32_1 : i32, i32, i32
  }
  func.func @transform_4(%arg0: i32) -> (i32, i32, i32) {
    %c0_i32 = arith.constant 0 : i32
    %c0_i32_0 = arith.constant 0 : i32
    %c0_i32_1 = arith.constant 0 : i32
    return %c0_i32, %arg0, %c0_i32_0 : i32, i32, i32
  }
}

</mosaic_0001>

<bundles_post_ra>
// kernel: fwd.3
= control target key start
LH: loop header
LB: loop body
LE: loop exit
PB: predicated region body
PF: predicated region fallthrough
CT: control target
= control target key end

     0   :  { %v1124_v1 = vmov 0   ;;  %vm399_vm0 = vcmask 261120   ;;  %s1556_s1 = inlined_call_operand.vmem [shape: bf16[288,256], index: 1, kind: input, shape index: {}]   ;;  %s1557_s0 = inlined_call_operand.vmem [shape: bf16[128,288], index: 0, kind: input, shape index: {}]   ;;  %s1558_s2 = inlined_call_operand.vmem [shape: f32[1,256], index: 2, kind: input, shape index: {}]   ;;  %s1559_s3 = inlined_call_operand.vmem [shape: f32[1,256], index: 3, kind: input, shape index: {}]   ;;  %s1560_s4 = inlined_call_operand.vmem [shape: bf16[128,256], index: 4, kind: output, shape index: {}]  }
   0x1   :  { %v1038_v0 = vld [vmem:[%s1556_s1 + $0x4] ss:$8 sps:$4 sm:$0xff]   ;;  %569 = vmatprep.mubr.bf16.mxu0 %v1124_v1  ;;  %v1040_v2 = vld [vmem:[%s1556_s1] ss:$8 sps:$4 sm:$0xff]   ;;  %v1041_v3 = vld [vmem:[%s1556_s1 + $0x14] ss:$8 sps:$4 sm:$0xff]  }
   0x2   :  { %424 = vmatprep.subr.bf16.mxu1 %v1038_v0  ;;  %v1043_v4 = vld [vmem:[%s1556_s1 + $0x10] ss:$8 sps:$4 sm:$0xff]   ;;  %v1044_v5 = vld [vmem:[%s1556_s1 + $0x24] ss:$8 sps:$4 sm:$0xff]   ;;  %v1046_v6 = vld [vmem:[%s1556_s1 + $0x20] ss:$8 sps:$4 sm:$0xff]  }
   0x3   :  { %425 = vmatpush1.bf16.msra.mxu1 %v1040_v2  ;;  %v1047_v7 = vld [vmem:[%s1556_s1 + $0x34] ss:$8 sps:$4 sm:$0xff]   ;;  %v1049_v8 = vld [vmem:[%s1556_s1 + $0x30] ss:$8 sps:$4 sm:$0xff]   ;;  %v1050_v9 = vld [vmem:[%s1556_s1 + $0x44] ss:$8 sps:$4 sm:$0xff]  }
   0x4   :  { %426 = vmatprep.subr.bf16.mxu1 %v1041_v3  ;;  %v1052_v10 = vld [vmem:[%s1556_s1 + $0x40] ss:$8 sps:$4 sm:$0xff]   ;;  %v1053_v11 = vld [vmem:[%s1556_s1 + $0x54] ss:$8 sps:$4 sm:$0xff]   ;;  %v1055_v12 = vld [vmem:[%s1556_s1 + $0x50] ss:$8 sps:$4 sm:$0xff]  }
   0x5   :  { %v1080_v13 = vld [vmem:[%s1556_s1 + $0x104] ss:$8 sps:$4 sm:$0xff]   ;;  %v1084_v15 = vld [vmem:[%s1556_s1 + $0x100] ss:$8 sps:$4 sm:$0xff]   ;;  %v1086_v16 = vld [vmem:[%s1556_s1 + $0x114] ss:$8 sps:$4 sm:$0xff]  }
   0x6   :  { %v1056_v14 = vld [vmem:[%s1556_s1 + $0x64] ss:$8 sps:$4 sm:$0xff]   ;;  %537 = vmatprep.subr.bf16.mxu0 %v1080_v13  ;;  %v1058_v17 = vld [vmem:[%s1556_s1 + $0x60] ss:$8 sps:$4 sm:$0xff]   ;;  %v1090_v18 = vld [vmem:[%s1556_s1 + $0x110] ss:$8 sps:$4 sm:$0xff]  }
   0x7   :  { %427 = vmatpush1.bf16.msra.mxu1 %v1043_v4  ;;  %538 = vmatpush1.bf16.msra.mxu0 %v1084_v15  ;;  %v1059_v19 = vld [vmem:[%s1556_s1 + $0x74] ss:$8 sps:$4 sm:$0xff]   ;;  %v1094_v20 = vld [vmem:[%s1557_s0 + $0x4] ss:$12 sps:$4 sm:$0xff]   ;;  %v1064_v24 = vld [vmem:[%s1556_s1 + $0x80] ss:$8 sps:$4 sm:$0xff]  }
   0x8   :  { %428 = vmatprep.subr.bf16.mxu1 %v1044_v5  ;;  %539 = vmatprep.subr.bf16.mxu0 %v1086_v16  ;;  %v1095_v21 = vld [vmem:[%s1557_s0 + $0x8] ss:$12 sps:$4 sm:$0xff]   ;;  %v1061_v22 = vld [vmem:[%s1556_s1 + $0x70] ss:$8 sps:$4 sm:$0xff]   ;;  %v1062_v23 = vld [vmem:[%s1556_s1 + $0x84] ss:$8 sps:$4 sm:$0xff]  }
   0x9   :  { %456 = vmatprep.mubr.bf16.mxu1 %v1094_v20  ;;  %v1065_v25 = vld [vmem:[%s1556_s1 + $0x94] ss:$8 sps:$4 sm:$0xff]   ;;  %v1098_v26 = vld [vmem:[%s1557_s0 + $0x20] ss:$12 sps:$4 sm:$0xff]   ;;  %v1067_v27 = vld [vmem:[%s1556_s1 + $0x90] ss:$8 sps:$4 sm:$0xff]  }
   0xa   :  { %v1068_v28 = vld [vmem:[%s1556_s1 + $0xa4] ss:$8 sps:$4 sm:$0xff]   ;;  %v1070_v29 = vld [vmem:[%s1556_s1 + $0xa0] ss:$8 sps:$4 sm:$0xff]   ;;  %v1071_v30 = vld [vmem:[%s1556_s1 + $0xb4] ss:$8 sps:$4 sm:$0xff]  }
   0xb   :  { %429 = vmatpush1.bf16.msra.mxu1 %v1046_v6  ;;  %540 = vmatpush1.bf16.msra.mxu0 %v1090_v18  ;;  %v1102_v31 = vld [vmem:[%s1557_s0 + $0x38] ss:$12 sps:$4 sm:$0xff]   ;;  %v1076_v34 = vld [vmem:[%s1556_s1 + $0xc0] ss:$8 sps:$4 sm:$0xff]   ;;  %v1077_v35 = vld [vmem:[%s1556_s1 + $0xd4] ss:$8 sps:$4 sm:$0xff]  }
   0xc   :  { %430 = vmatprep.subr.bf16.mxu1 %v1047_v7  ;;  %v1073_v32 = vld [vmem:[%s1556_s1 + $0xb0] ss:$8 sps:$4 sm:$0xff]   ;;  %v1074_v33 = vld [vmem:[%s1556_s1 + $0xc4] ss:$8 sps:$4 sm:$0xff]   ;;  %v1085_v39 = vld [vmem:[%s1556_s1 + $0xe0] ss:$8 sps:$4 sm:$0xff]  }
   0xd   :  { %v1106_v36 = vld [vmem:[%s1557_s0 + $0x50] ss:$12 sps:$4 sm:$0xff]   ;;  %v1082_v38 = vld [vmem:[%s1556_s1 + $0xe4] ss:$8 sps:$4 sm:$0xff]   ;;  %v1110_v41 = vld [vmem:[%s1557_s0 + $0x68] ss:$12 sps:$4 sm:$0xff]  }
   0xe   :  { %933 = vmatmul.mubr.msk.bf16.vlgmr.msra.gmra.mrb[0].mxu0 %vm399_vm0, %v1095_v21  ;;  %v1079_v37 = vld [vmem:[%s1556_s1 + $0xd0] ss:$8 sps:$4 sm:$0xff]   ;;  %v1088_v40 = vld [vmem:[%s1556_s1 + $0xf4] ss:$8 sps:$4 sm:$0xff]   ;;  %v1092_v43 = vld [vmem:[%s1557_s0] ss:$12 sps:$4 sm:$0xff]  }
   0xf   :  { %431 = vmatpush1.bf16.msra.mxu1 %v1049_v8  ;;  %579 = vmatprep.mubr.bf16.mxu0 %v1124_v1  ;;  %v1091_v42 = vld [vmem:[%s1556_s1 + $0xf0] ss:$8 sps:$4 sm:$0xff]   ;;  %v1096_v44 = vld [vmem:[%s1557_s0 + $0x1c] ss:$12 sps:$4 sm:$0xff]   ;;  %v1114_v45 = vld [vmem:[%s1557_s0 + $0x80] ss:$12 sps:$4 sm:$0xff]  }
  0x10   :  { %432 = vmatprep.subr.bf16.mxu1 %v1050_v9  ;;  %v1099_v46 = vld [vmem:[%s1557_s0 + $0x18] ss:$12 sps:$4 sm:$0xff]   ;;  %v1100_v47 = vld [vmem:[%s1557_s0 + $0x34] ss:$12 sps:$4 sm:$0xff]   ;;  %v1103_v49 = vld [vmem:[%s1557_s0 + $0x30] ss:$12 sps:$4 sm:$0xff]   ;;  %v89_v9 = vlaneseq }
  0x11   :  { %v1118_v48 = vld [vmem:[%s1557_s0 + $0x98] ss:$12 sps:$4 sm:$0xff]   ;;  %v1122_v51 = vld [vmem:[%s1557_s0 + $0xb0] ss:$12 sps:$4 sm:$0xff]   ;;  %v1107_v52 = vld [vmem:[%s1557_s0 + $0x48] ss:$12 sps:$4 sm:$0xff]  }
  0x12   :  { %v1104_v50 = vld [vmem:[%s1557_s0 + $0x4c] ss:$12 sps:$4 sm:$0xff]   ;;  %v1108_v53 = vld [vmem:[%s1557_s0 + $0x64] ss:$12 sps:$4 sm:$0xff]   ;;  %v1112_v55 = vld [vmem:[%s1557_s0 + $0x7c] ss:$12 sps:$4 sm:$0xff]  }
  0x13   :  { %433 = vmatpush1.bf16.msra.mxu1 %v1052_v10  ;;  %v1111_v54 = vld [vmem:[%s1557_s0 + $0x60] ss:$12 sps:$4 sm:$0xff]   ;;  %v1115_v56 = vld [vmem:[%s1557_s0 + $0x78] ss:$12 sps:$4 sm:$0xff]   ;;  %v1119_v58 = vld [vmem:[%s1557_s0 + $0x90] ss:$12 sps:$4 sm:$0xff]  }
  0x14   :  { %434 = vmatprep.subr.bf16.mxu1 %v1053_v11  ;;  %v1116_v57 = vld [vmem:[%s1557_s0 + $0x94] ss:$12 sps:$4 sm:$0xff]   ;;  %v1120_v59 = vld [vmem:[%s1557_s0 + $0xac] ss:$12 sps:$4 sm:$0xff]  }
  0x15   :  { %v1123_v60 = vld [vmem:[%s1557_s0 + $0xa8] ss:$12 sps:$4 sm:$0xff]   ;;  %v86_v16 = vld [vmem:[%s1558_s2] sm:$0x3] }
  0x16   :  { %934 = vmatmul.mubr.msk.bf16.gmra.mrb[4].mxu0 %vm399_vm0, %v1098_v26 }
  0x17   :  { %435 = vmatpush1.bf16.msra.mxu1 %v1055_v12  ;;  %589 = vmatprep.mubr.bf16.mxu0 %v1124_v1  ;;  %v90_v12 = vshrl.u32 %v89_v9, 7 }
  0x18   :  { %436 = vmatprep.subr.bf16.mxu1 %v1056_v14 }
  0x19   :  { %v91_v15 = vsub.s32 0, %v90_v12 }
  0x1b   :  { %437 = vmatpush1.bf16.msra.mxu1 %v1058_v17  ;;  %v95_v17 = vsub.s32 1, %v90_v12  ;;  %v1377_v20 = vrot.slane %v86_v16, %v91_v15 }
  0x1c   :  { %438 = vmatprep.subr.bf16.mxu1 %v1059_v19 }
  0x1e   :  { %935 = vmatmul.mubr.msk.bf16.gmra.mrb[8].mxu0 %vm399_vm0, %v1102_v31 }
  0x1f   :  { %439 = vmatpush1.bf16.msra.mxu1 %v1061_v22  ;;  %599 = vmatprep.mubr.bf16.mxu0 %v1124_v1  ;;  %v87_v22 = vld [vmem:[%s1559_s3] sm:$0x3] }
  0x20   :  { %440 = vmatprep.subr.bf16.mxu1 %v1062_v23  ;;  %v1384_v23 = vrot.slane %v86_v16, %v95_v17 }
  0x23   :  { %441 = vmatpush1.bf16.msra.mxu1 %v1064_v24 }
  0x24   :  { %442 = vmatprep.subr.bf16.mxu1 %v1065_v25 }
  0x26   :  { %936 = vmatmul.mubr.msk.bf16.gmra.mrb[12].mxu0 %vm399_vm0, %v1106_v36 }
  0x27   :  { %443 = vmatpush1.bf16.msra.mxu1 %v1067_v27  ;;  %609 = vmatprep.mubr.bf16.mxu0 %v1124_v1  ;;  %v1389_v27 = vrot.slane %v87_v22, %v91_v15 }
  0x28   :  { %444 = vmatprep.subr.bf16.mxu1 %v1068_v28 }
  0x2b   :  { %445 = vmatpush1.bf16.msra.mxu1 %v1070_v29 }
  0x2c   :  { %446 = vmatprep.subr.bf16.mxu1 %v1071_v30  ;;  %v1392_v30 = vrot.slane %v87_v22, %v95_v17 }
  0x2e   :  { %937 = vmatmul.mubr.msk.bf16.gmra.mrb[16].mxu0 %vm399_vm0, %v1110_v41 }
  0x2f   :  { %447 = vmatpush1.bf16.msra.mxu1 %v1073_v32  ;;  %619 = vmatprep.mubr.bf16.mxu0 %v1124_v1 }
  0x30   :  { %448 = vmatprep.subr.bf16.mxu1 %v1074_v33 }
  0x33   :  { %449 = vmatpush1.bf16.msra.mxu1 %v1076_v34 }
  0x34   :  { %450 = vmatprep.subr.bf16.mxu1 %v1077_v35 }
  0x36   :  { %938 = vmatmul.mubr.msk.bf16.gmra.mrb[20].mxu0 %vm399_vm0, %v1114_v45 }
  0x37   :  { %451 = vmatpush1.bf16.msra.mxu1 %v1079_v37  ;;  %629 = vmatprep.mubr.bf16.mxu0 %v1124_v1 }
  0x38   :  { %452 = vmatprep.subr.bf16.mxu1 %v1082_v38 }
  0x3b   :  { %453 = vmatpush1.bf16.msra.mxu1 %v1085_v39 }
  0x3c   :  { %454 = vmatprep.subr.bf16.mxu1 %v1088_v40 }
  0x3e   :  { %939 = vmatmul.mubr.msk.bf16.gmra.mrb[24].mxu0 %vm399_vm0, %v1118_v48 }
  0x3f   :  { %455 = vmatpush1.bf16.msra.mxu1 %v1091_v42  ;;  %639 = vmatprep.mubr.bf16.mxu0 %v1124_v1 }
  0x42   :  { %457 = vmatmul.mubr.bf16.vlgmr.msra.gmra.mrb[0].mxu1 %v1092_v43 }
  0x43   :  { %466 = vmatprep.mubr.bf16.mxu1 %v1096_v44 }
  0x46   :  { %940 = vmatmul.mubr.msk.bf16.gmra.mrb[28].mxu0 %vm399_vm0, %v1122_v51 }
  0x4a   :  { %467 = vmatmul.mubr.bf16.gmra.mrb[4].mxu1 %v1099_v46 }
  0x4b   :  { %476 = vmatprep.mubr.bf16.mxu1 %v1100_v47 }
  0x52   :  { %477 = vmatmul.mubr.bf16.gmra.mrb[8].mxu1 %v1103_v49 }
  0x53   :  { %486 = vmatprep.mubr.bf16.mxu1 %v1104_v50 }
  0x5a   :  { %487 = vmatmul.mubr.bf16.gmra.mrb[12].mxu1 %v1107_v52 }
  0x5b   :  { %496 = vmatprep.mubr.bf16.mxu1 %v1108_v53 }
  0x62   :  { %497 = vmatmul.mubr.bf16.gmra.mrb[16].mxu1 %v1111_v54 }
  0x63   :  { %506 = vmatprep.mubr.bf16.mxu1 %v1112_v55 }
  0x6a   :  { %507 = vmatmul.mubr.bf16.gmra.mrb[20].mxu1 %v1115_v56 }
  0x6b   :  { %516 = vmatprep.mubr.bf16.mxu1 %v1116_v57 }
  0x72   :  { %517 = vmatmul.mubr.bf16.gmra.mrb[24].mxu1 %v1119_v58 }
  0x73   :  { %526 = vmatprep.mubr.bf16.mxu1 %v1120_v59 }
  0x7a   :  { %527 = vmatmul.mubr.bf16.gmra.mrb[28].mxu1 %v1123_v60 }
  0xe1   :  { %v571_v61 = vpop.f32.mrb[0].mxu0 }
  0xe2   :  { %v573_v62 = vpop.f32.mrb[1].mxu0 }
  0xe3   :  { %v575_v63 = vpop.f32.mrb[2].mxu0 }
  0xe4   :  { %v577_v0 = vpop.f32.mrb[3].mxu0 }
  0xe9   :  { %v1346_v1 = vpop.f32.mrb[4].mxu0 }
  0xea   :  { %v1348_v2 = vpop.f32.mrb[5].mxu0 }
  0xeb   :  { %v1350_v3 = vpop.f32.mrb[6].mxu0 }
  0xec   :  { %v1352_v4 = vpop.f32.mrb[7].mxu0 }
  0xf1   :  { %v1354_v5 = vpop.f32.mrb[8].mxu0 }
  0xf2   :  { %v1356_v6 = vpop.f32.mrb[9].mxu0 }
  0xf3   :  { %v1358_v7 = vpop.f32.mrb[10].mxu0 }
  0xf4   :  { %v1360_v8 = vpop.f32.mrb[11].mxu0 }
  0xf9   :  { %v1362_v10 = vpop.f32.mrb[12].mxu0 }
  0xfa   :  { %v1364_v11 = vpop.f32.mrb[13].mxu0 }
  0xfb   :  { %v1366_v13 = vpop.f32.mrb[14].mxu0 }
  0xfc   :  { %v1368_v14 = vpop.f32.mrb[15].mxu0 }
 0x101   :  { %v1373_v18 = vpop.f32.mrb[16].mxu0 }
 0x102   :  { %v1375_v19 = vpop.f32.mrb[17].mxu0 }
 0x103   :  { %v1379_v21 = vpop.f32.mrb[18].mxu0 }
 0x104   :  { %v1386_v24 = vpop.f32.mrb[19].mxu0 }
 0x109   :  { %v1395_v35 = vpop.f32.mrb[20].mxu0 }
 0x10a   :  { %v1398_v38 = vpop.f32.mrb[21].mxu0 }
 0x10b   :  { %v1401_v41 = vpop.f32.mrb[22].mxu0 }
 0x10c   :  { %v1404_v44 = vpop.f32.mrb[23].mxu0 }
 0x115   :  { %v458_v25 = vpop.f32.mrb[0].mxu1 }
 0x116   :  { %v459_v26 = vadd.f32 %v458_v25, %v1377_v20  ;;  %v460_v28 = vpop.f32.mrb[1].mxu1 }
 0x117   :  { %v461_v29 = vadd.f32 %v460_v28, %v1384_v23  ;;  %v462_v31 = vpop.f32.mrb[2].mxu1 }
 0x118   :  { %v572_v32 = vadd.f32 %v571_v61, %v459_v26  ;;  %v463_v33 = vadd.f32 %v462_v31, %v1377_v20  ;;  %v464_v34 = vpop.f32.mrb[3].mxu1  ;;  %v1415_v61 = vpop.f32.mrb[24].mxu0 }
 0x119   :  { %v574_v36 = vadd.f32 %v573_v62, %v461_v29  ;;  %v465_v37 = vadd.f32 %v464_v34, %v1384_v23 }
 0x11a   :  { %vm650_vm1 = vcmp.ge.f32.partialorder %v572_v32, 0.0  ;;  %v693_v39 = vmul.f32 %v1389_v27, %v572_v32  ;;  %v576_v40 = vadd.f32 %v575_v63, %v463_v33 }
 0x11b   :  { %vm651_vm2 = vcmp.ge.f32.partialorder %v574_v36, 0.0  ;;  %v694_v42 = vmul.f32 %v1392_v30, %v574_v36  ;;  %v578_v43 = vadd.f32 %v577_v0, %v465_v37  ;;  %v1419_v0 = vpop.f32.mrb[25].mxu0 }
 0x11c   :  { %v725_v45 = vsel %vm650_vm1, %v572_v32, %v693_v39  ;;  %vm652_vm3 = vcmp.ge.f32.partialorder %v576_v40, 0.0  ;;  %v695_v46 = vmul.f32 %v1389_v27, %v576_v40  ;;  %v1426_v12 = vpop.f32.mrb[26].mxu0 }
 0x11d   :  { %v726_v47 = vsel %vm651_vm2, %v574_v36, %v694_v42  ;;  %vm653_vm4 = vcmp.ge.f32.partialorder %v578_v43, 0.0  ;;  %v696_v48 = vmul.f32 %v1392_v30, %v578_v43  ;;  %v468_v49 = vpop.f32.mrb[4].mxu1  ;;  %v1430_v16 = vpop.f32.mrb[27].mxu0 }
 0x11e   :  { %v957_v50 = vpack.c.bf16 %v726_v47, %v725_v45  ;;  %v727_v51 = vsel %vm652_vm3, %v576_v40, %v695_v46  ;;  %v469_v52 = vadd.f32 %v468_v49, %v1377_v20  ;;  %v470_v53 = vpop.f32.mrb[5].mxu1  ;;  %v1441_v42 = vpop.f32.mrb[28].mxu0 }
 0x11f   :  { %v728_v54 = vsel %vm653_vm4, %v578_v43, %v696_v48  ;;  %v471_v55 = vadd.f32 %v470_v53, %v1384_v23  ;;  %v472_v56 = vpop.f32.mrb[6].mxu1  ;;  %v1445_v46 = vpop.f32.mrb[29].mxu0 }
 0x120   :  { %853 = vst [vmem:[%s1560_s4] sm:$0xff] %v957_v50  ;;  %v958_v57 = vpack.c.bf16 %v728_v54, %v727_v51  ;;  %v582_v58 = vadd.f32 %v1346_v1, %v469_v52  ;;  %v473_v59 = vadd.f32 %v472_v56, %v1377_v20  ;;  %v474_v60 = vpop.f32.mrb[7].mxu1  ;;  %v1452_v48 = vpop.f32.mrb[30].mxu0 }
 0x121   :  { %v584_v62 = vadd.f32 %v1348_v2, %v471_v55  ;;  %v475_v63 = vadd.f32 %v474_v60, %v1384_v23  ;;  %v1456_v50 = vpop.f32.mrb[31].mxu0 }
 0x122   :  { %854 = vst [vmem:[%s1560_s4 + $0x8] sm:$0xff] %v958_v57  ;;  %vm654_vm5 = vcmp.ge.f32.partialorder %v582_v58, 0.0  ;;  %v697_v9 = vmul.f32 %v1389_v27, %v582_v58  ;;  %v586_v1 = vadd.f32 %v1350_v3, %v473_v59 }
 0x123   :  { %vm655_vm6 = vcmp.ge.f32.partialorder %v584_v62, 0.0  ;;  %v698_v15 = vmul.f32 %v1392_v30, %v584_v62  ;;  %v588_v2 = vadd.f32 %v1352_v4, %v475_v63 }
 0x124   :  { %v729_v17 = vsel %vm654_vm5, %v582_v58, %v697_v9  ;;  %vm656_vm7 = vcmp.ge.f32.partialorder %v586_v1, 0.0  ;;  %v699_v22 = vmul.f32 %v1389_v27, %v586_v1 }
 0x125   :  { %v730_v25 = vsel %vm655_vm6, %v584_v62, %v698_v15  ;;  %vm657_vm8 = vcmp.ge.f32.partialorder %v588_v2, 0.0  ;;  %v700_v26 = vmul.f32 %v1392_v30, %v588_v2  ;;  %v478_v28 = vpop.f32.mrb[8].mxu1 }
 0x126   :  { %v959_v29 = vpack.c.bf16 %v730_v25, %v729_v17  ;;  %v731_v3 = vsel %vm656_vm7, %v586_v1, %v699_v22  ;;  %v479_v31 = vadd.f32 %v478_v28, %v1377_v20  ;;  %v480_v32 = vpop.f32.mrb[9].mxu1 }
 0x127   :  { %v732_v33 = vsel %vm657_vm8, %v588_v2, %v700_v26  ;;  %v481_v34 = vadd.f32 %v480_v32, %v1384_v23  ;;  %v482_v4 = vpop.f32.mrb[10].mxu1 }
 0x128   :  { %855 = vst [vmem:[%s1560_s4 + $0x10] sm:$0xff] %v959_v29  ;;  %v960_v36 = vpack.c.bf16 %v732_v33, %v731_v3  ;;  %v592_v37 = vadd.f32 %v1354_v5, %v479_v31  ;;  %v483_v39 = vadd.f32 %v482_v4, %v1377_v20  ;;  %v484_v40 = vpop.f32.mrb[11].mxu1 }
 0x129   :  { %v594_v43 = vadd.f32 %v1356_v6, %v481_v34  ;;  %v485_v45 = vadd.f32 %v484_v40, %v1384_v23 }
 0x12a   :  { %856 = vst [vmem:[%s1560_s4 + $0x18] sm:$0xff] %v960_v36  ;;  %vm658_vm9 = vcmp.ge.f32.partialorder %v592_v37, 0.0  ;;  %v701_v47 = vmul.f32 %v1389_v27, %v592_v37  ;;  %v596_v5 = vadd.f32 %v1358_v7, %v483_v39 }
 0x12b   :  { %vm659_vm10 = vcmp.ge.f32.partialorder %v594_v43, 0.0  ;;  %v702_v49 = vmul.f32 %v1392_v30, %v594_v43  ;;  %v598_v6 = vadd.f32 %v1360_v8, %v485_v45 }
 0x12c   :  { %v733_v51 = vsel %vm658_vm9, %v592_v37, %v701_v47  ;;  %vm660_vm11 = vcmp.ge.f32.partialorder %v596_v5, 0.0  ;;  %v703_v52 = vmul.f32 %v1389_v27, %v596_v5 }
 0x12d   :  { %v734_v53 = vsel %vm659_vm10, %v594_v43, %v702_v49  ;;  %vm661_vm12 = vcmp.ge.f32.partialorder %v598_v6, 0.0  ;;  %v704_v54 = vmul.f32 %v1392_v30, %v598_v6  ;;  %v488_v55 = vpop.f32.mrb[12].mxu1 }
 0x12e   :  { %v961_v56 = vpack.c.bf16 %v734_v53, %v733_v51  ;;  %v735_v7 = vsel %vm660_vm11, %v596_v5, %v703_v52  ;;  %v489_v57 = vadd.f32 %v488_v55, %v1377_v20  ;;  %v490_v58 = vpop.f32.mrb[13].mxu1 }
 0x12f   :  { %v736_v59 = vsel %vm661_vm12, %v598_v6, %v704_v54  ;;  %v491_v60 = vadd.f32 %v490_v58, %v1384_v23  ;;  %v492_v8 = vpop.f32.mrb[14].mxu1 }
 0x130   :  { %857 = vst [vmem:[%s1560_s4 + $0x20] sm:$0xff] %v961_v56  ;;  %v962_v62 = vpack.c.bf16 %v736_v59, %v735_v7  ;;  %v602_v63 = vadd.f32 %v1362_v10, %v489_v57  ;;  %v493_v9 = vadd.f32 %v492_v8, %v1377_v20  ;;  %v494_v1 = vpop.f32.mrb[15].mxu1 }
 0x131   :  { %v604_v15 = vadd.f32 %v1364_v11, %v491_v60  ;;  %v495_v2 = vadd.f32 %v494_v1, %v1384_v23 }
 0x132   :  { %858 = vst [vmem:[%s1560_s4 + $0x28] sm:$0xff] %v962_v62  ;;  %vm662_vm13 = vcmp.ge.f32.partialorder %v602_v63, 0.0  ;;  %v705_v17 = vmul.f32 %v1389_v27, %v602_v63  ;;  %v606_v22 = vadd.f32 %v1366_v13, %v493_v9 }
 0x133   :  { %vm663_vm14 = vcmp.ge.f32.partialorder %v604_v15, 0.0  ;;  %v706_v25 = vmul.f32 %v1392_v30, %v604_v15  ;;  %v608_v10 = vadd.f32 %v1368_v14, %v495_v2 }
 0x134   :  { %v737_v26 = vsel %vm662_vm13, %v602_v63, %v705_v17  ;;  %vm664_vm15 = vcmp.ge.f32.partialorder %v606_v22, 0.0  ;;  %v707_v11 = vmul.f32 %v1389_v27, %v606_v22 }
 0x135   :  { %v738_v28 = vsel %vm663_vm14, %v604_v15, %v706_v25  ;;  %vm665_vm0 = vcmp.ge.f32.partialorder %v608_v10, 0.0  ;;  %v708_v29 = vmul.f32 %v1392_v30, %v608_v10  ;;  %v498_v3 = vpop.f32.mrb[16].mxu1 }
 0x136   :  { %v963_v31 = vpack.c.bf16 %v738_v28, %v737_v26  ;;  %v739_v32 = vsel %vm664_vm15, %v606_v22, %v707_v11  ;;  %v499_v33 = vadd.f32 %v498_v3, %v1377_v20  ;;  %v500_v34 = vpop.f32.mrb[17].mxu1 }
 0x137   :  { %v740_v13 = vsel %vm665_vm0, %v608_v10, %v708_v29  ;;  %v501_v4 = vadd.f32 %v500_v34, %v1384_v23  ;;  %v502_v36 = vpop.f32.mrb[18].mxu1 }
 0x138   :  { %859 = vst [vmem:[%s1560_s4 + $0x30] sm:$0xff] %v963_v31  ;;  %v964_v14 = vpack.c.bf16 %v740_v13, %v739_v32  ;;  %v612_v37 = vadd.f32 %v1373_v18, %v499_v33  ;;  %v503_v39 = vadd.f32 %v502_v36, %v1377_v20  ;;  %v504_v40 = vpop.f32.mrb[19].mxu1 }
 0x139   :  { %v614_v43 = vadd.f32 %v1375_v19, %v501_v4  ;;  %v505_v45 = vadd.f32 %v504_v40, %v1384_v23 }
 0x13a   :  { %860 = vst [vmem:[%s1560_s4 + $0x38] sm:$0xff] %v964_v14  ;;  %vm666_vm1 = vcmp.ge.f32.partialorder %v612_v37, 0.0  ;;  %v709_v47 = vmul.f32 %v1389_v27, %v612_v37  ;;  %v616_v5 = vadd.f32 %v1379_v21, %v503_v39 }
 0x13b   :  { %vm667_vm2 = vcmp.ge.f32.partialorder %v614_v43, 0.0  ;;  %v710_v49 = vmul.f32 %v1392_v30, %v614_v43  ;;  %v618_v18 = vadd.f32 %v1386_v24, %v505_v45 }
 0x13c   :  { %v741_v6 = vsel %vm666_vm1, %v612_v37, %v709_v47  ;;  %vm668_vm3 = vcmp.ge.f32.partialorder %v616_v5, 0.0  ;;  %v711_v19 = vmul.f32 %v1389_v27, %v616_v5 }
 0x13d   :  { %v742_v51 = vsel %vm667_vm2, %v614_v43, %v710_v49  ;;  %vm669_vm4 = vcmp.ge.f32.partialorder %v618_v18, 0.0  ;;  %v712_v52 = vmul.f32 %v1392_v30, %v618_v18  ;;  %v508_v53 = vpop.f32.mrb[20].mxu1 }
 0x13e   :  { %v965_v54 = vpack.c.bf16 %v742_v51, %v741_v6  ;;  %v743_v55 = vsel %vm668_vm3, %v616_v5, %v711_v19  ;;  %v509_v56 = vadd.f32 %v508_v53, %v1377_v20  ;;  %v510_v7 = vpop.f32.mrb[21].mxu1 }
 0x13f   :  { %v744_v21 = vsel %vm669_vm4, %v618_v18, %v712_v52  ;;  %v511_v57 = vadd.f32 %v510_v7, %v1384_v23  ;;  %v512_v58 = vpop.f32.mrb[22].mxu1 }
 0x140   :  { %861 = vst [vmem:[%s1560_s4 + $0x40] sm:$0xff] %v965_v54  ;;  %v966_v24 = vpack.c.bf16 %v744_v21, %v743_v55  ;;  %v622_v59 = vadd.f32 %v1395_v35, %v509_v56  ;;  %v513_v60 = vadd.f32 %v512_v58, %v1377_v20  ;;  %v514_v8 = vpop.f32.mrb[23].mxu1 }
 0x141   :  { %v624_v62 = vadd.f32 %v1398_v38, %v511_v57  ;;  %v515_v63 = vadd.f32 %v514_v8, %v1384_v23 }
 0x142   :  { %862 = vst [vmem:[%s1560_s4 + $0x48] sm:$0xff] %v966_v24  ;;  %vm670_vm5 = vcmp.ge.f32.partialorder %v622_v59, 0.0  ;;  %v713_v9 = vmul.f32 %v1389_v27, %v622_v59  ;;  %v626_v1 = vadd.f32 %v1401_v41, %v513_v60 }
 0x143   :  { %vm671_vm6 = vcmp.ge.f32.partialorder %v624_v62, 0.0  ;;  %v714_v15 = vmul.f32 %v1392_v30, %v624_v62  ;;  %v628_v35 = vadd.f32 %v1404_v44, %v515_v63 }
 0x144   :  { %v745_v2 = vsel %vm670_vm5, %v622_v59, %v713_v9  ;;  %vm672_vm7 = vcmp.ge.f32.partialorder %v626_v1, 0.0  ;;  %v715_v38 = vmul.f32 %v1389_v27, %v626_v1 }
 0x145   :  { %v746_v17 = vsel %vm671_vm6, %v624_v62, %v714_v15  ;;  %vm673_vm8 = vcmp.ge.f32.partialorder %v628_v35, 0.0  ;;  %v716_v22 = vmul.f32 %v1392_v30, %v628_v35  ;;  %v518_v25 = vpop.f32.mrb[24].mxu1 }
 0x146   :  { %v967_v10 = vpack.c.bf16 %v746_v17, %v745_v2  ;;  %v747_v26 = vsel %vm672_vm7, %v626_v1, %v715_v38  ;;  %v519_v11 = vadd.f32 %v518_v25, %v1377_v20  ;;  %v520_v28 = vpop.f32.mrb[25].mxu1 }
 0x147   :  { %v748_v41 = vsel %vm673_vm8, %v628_v35, %v716_v22  ;;  %v521_v29 = vadd.f32 %v520_v28, %v1384_v23  ;;  %v522_v3 = vpop.f32.mrb[26].mxu1 }
 0x148   :  { %863 = vst [vmem:[%s1560_s4 + $0x50] sm:$0xff] %v967_v10  ;;  %v968_v44 = vpack.c.bf16 %v748_v41, %v747_v26  ;;  %v632_v31 = vadd.f32 %v1415_v61, %v519_v11  ;;  %v523_v32 = vadd.f32 %v522_v3, %v1377_v20  ;;  %v524_v33 = vpop.f32.mrb[27].mxu1 }
 0x149   :  { %v634_v34 = vadd.f32 %v1419_v0, %v521_v29  ;;  %v525_v13 = vadd.f32 %v524_v33, %v1384_v23 }
 0x14a   :  { %864 = vst [vmem:[%s1560_s4 + $0x58] sm:$0xff] %v968_v44  ;;  %vm674_vm9 = vcmp.ge.f32.partialorder %v632_v31, 0.0  ;;  %v717_v4 = vmul.f32 %v1389_v27, %v632_v31  ;;  %v636_v36 = vadd.f32 %v1426_v12, %v523_v32 }
 0x14b   :  { %vm675_vm10 = vcmp.ge.f32.partialorder %v634_v34, 0.0  ;;  %v718_v14 = vmul.f32 %v1392_v30, %v634_v34  ;;  %v638_v61 = vadd.f32 %v1430_v16, %v525_v13 }
 0x14c   :  { %v749_v37 = vsel %vm674_vm9, %v632_v31, %v717_v4  ;;  %vm676_vm11 = vcmp.ge.f32.partialorder %v636_v36, 0.0  ;;  %v719_v0 = vmul.f32 %v1389_v27, %v636_v36 }
 0x14d   :  { %v750_v39 = vsel %vm675_vm10, %v634_v34, %v718_v14  ;;  %vm677_vm12 = vcmp.ge.f32.partialorder %v638_v61, 0.0  ;;  %v720_v40 = vmul.f32 %v1392_v30, %v638_v61  ;;  %v528_v43 = vpop.f32.mrb[28].mxu1 }
 0x14e   :  { %v969_v45 = vpack.c.bf16 %v750_v39, %v749_v37  ;;  %v751_v47 = vsel %vm676_vm11, %v636_v36, %v719_v0  ;;  %v529_v5 = vadd.f32 %v528_v43, %v1377_v20  ;;  %v530_v49 = vpop.f32.mrb[29].mxu1 }
 0x14f   :  { %v752_v12 = vsel %vm677_vm12, %v638_v61, %v720_v40  ;;  %v531_v18 = vadd.f32 %v530_v49, %v1384_v23  ;;  %v532_v6 = vpop.f32.mrb[30].mxu1 }
 0x150   :  { %865 = vst [vmem:[%s1560_s4 + $0x60] sm:$0xff] %v969_v45  ;;  %v970_v16 = vpack.c.bf16 %v752_v12, %v751_v47  ;;  %v642_v19 = vadd.f32 %v1441_v42, %v529_v5  ;;  %v533_v51 = vadd.f32 %v532_v6, %v1377_v20  ;;  %v534_v52 = vpop.f32.mrb[31].mxu1 }
 0x151   :  { %v644_v53 = vadd.f32 %v1445_v46, %v531_v18  ;;  %v535_v54 = vadd.f32 %v534_v52, %v1384_v23 }
 0x152   :  { %866 = vst [vmem:[%s1560_s4 + $0x68] sm:$0xff] %v970_v16  ;;  %vm678_vm13 = vcmp.ge.f32.partialorder %v642_v19, 0.0  ;;  %v721_v55 = vmul.f32 %v1389_v27, %v642_v19  ;;  %v646_v56 = vadd.f32 %v1452_v48, %v533_v51 }
 0x153   :  { %vm679_vm14 = vcmp.ge.f32.partialorder %v644_v53, 0.0  ;;  %v722_v7 = vmul.f32 %v1392_v30, %v644_v53  ;;  %v648_v42 = vadd.f32 %v1456_v50, %v535_v54 }
 0x154   :  { %v753_v20 = vsel %vm678_vm13, %v642_v19, %v721_v55  ;;  %vm680_vm15 = vcmp.ge.f32.partialorder %v646_v56, 0.0  ;;  %v723_v46 = vmul.f32 %v1389_v27, %v646_v56 }
 0x155   :  { %v754_v21 = vsel %vm679_vm14, %v644_v53, %v722_v7  ;;  %vm681_vm0 = vcmp.ge.f32.partialorder %v648_v42, 0.0  ;;  %v724_v23 = vmul.f32 %v1392_v30, %v648_v42 }
 0x156   :  { %v971_v57 = vpack.c.bf16 %v754_v21, %v753_v20  ;;  %v755_v58 = vsel %vm680_vm15, %v646_v56, %v723_v46 }
 0x157   :  { %v756_v24 = vsel %vm681_vm0, %v648_v42, %v724_v23 }
 0x158   :  { %867 = vst [vmem:[%s1560_s4 + $0x70] sm:$0xff] %v971_v57  ;;  %v972_v48 = vpack.c.bf16 %v756_v24, %v755_v58 }
 0x15a   :  { %868 = vst [vmem:[%s1560_s4 + $0x78] sm:$0xff] %v972_v48 }

// kernel: tile.6
= control target key start
LH: loop header
LB: loop body
LE: loop exit
PB: predicated region body
PF: predicated region fallthrough
CT: control target
= control target key end

     0   :  { %s20_s0 = inlined_call_operand.<no memory space> [shape: f32[], index: 0, kind: input, shape index: {}]   ;;  %s21_s1 = inlined_call_operand.vmem [shape: f32[1,1,128], index: 1, kind: output, shape index: {}]  }
   0x1   :  { %v2_v0 = vstv %s20_s0 }
   0x2   :  { %3 = vst [vmem:[%s21_s1] sm:$0x1] %v2_v0 }

// kernel: fwd.4
= control target key start
LH: loop header
LB: loop body
LE: loop exit
PB: predicated region body
PF: predicated region fallthrough
CT: control target
= control target key end

     0   :  { %vm562_vm0 = vcmask 523264   ;;  %s1692_s1 = inlined_call_operand.vmem [shape: bf16[576,128], index: 1, kind: input, shape index: {}]   ;;  %s1693_s0 = inlined_call_operand.vmem [shape: bf16[128,576], index: 0, kind: input, shape index: {}]   ;;  %s1694_s2 = inlined_call_operand.vmem [shape: f32[1,128], index: 2, kind: input, shape index: {}]   ;;  %s1695_s3 = inlined_call_operand.vmem [shape: f32[1,128], index: 3, kind: input, shape index: {}]   ;;  %s1696_s4 = inlined_call_operand.vmem [shape: f32[128,128], index: 4, kind: output, shape index: {}]  }
   0x1   :  { %v1210_v0 = vld [vmem:[%s1692_s1 + $0x40] sm:$0xff]   ;;  %v1214_v4 = vld [vmem:[%s1692_s1 + $0x48] sm:$0xff]   ;;  %v1218_v8 = vld [vmem:[%s1692_s1 + $0x50] sm:$0xff]  }
   0x2   :  { %v1211_v1 = vld [vmem:[%s1692_s1 + $0xc0] sm:$0xff]   ;;  %1038 = vmatprep.subr.bf16.mxu0 %v1210_v0  ;;  %v1215_v5 = vld [vmem:[%s1692_s1 + $0xc8] sm:$0xff]   ;;  %v1219_v9 = vld [vmem:[%s1692_s1 + $0xd0] sm:$0xff]  }
   0x3   :  { %v1212_v2 = vld [vmem:[%s1692_s1] sm:$0xff]   ;;  %1102 = vmatprep.subr.bf16.mxu1 %v1211_v1  ;;  %v1216_v6 = vld [vmem:[%s1692_s1 + $0x8] sm:$0xff]   ;;  %v1220_v10 = vld [vmem:[%s1692_s1 + $0x10] sm:$0xff]  }
   0x4   :  { %v1213_v3 = vld [vmem:[%s1692_s1 + $0x80] sm:$0xff]   ;;  %1039 = vmatpush3.bf16.msra.mxu0 %v1212_v2  ;;  %v1217_v7 = vld [vmem:[%s1692_s1 + $0x88] sm:$0xff]   ;;  %v1221_v11 = vld [vmem:[%s1692_s1 + $0x90] sm:$0xff]  }
   0x5   :  { %1103 = vmatpush3.bf16.msra.mxu1 %v1213_v3  ;;  %1040 = vmatprep.subr.bf16.mxu0 %v1214_v4  ;;  %v1222_v12 = vld [vmem:[%s1692_s1 + $0x58] sm:$0xff]   ;;  %v1226_v16 = vld [vmem:[%s1692_s1 + $0x60] sm:$0xff]   ;;  %v1230_v20 = vld [vmem:[%s1692_s1 + $0x68] sm:$0xff]  }
   0x6   :  { %1104 = vmatprep.subr.bf16.mxu1 %v1215_v5  ;;  %v1223_v13 = vld [vmem:[%s1692_s1 + $0xd8] sm:$0xff]   ;;  %v1227_v17 = vld [vmem:[%s1692_s1 + $0xe0] sm:$0xff]   ;;  %v1231_v21 = vld [vmem:[%s1692_s1 + $0xe8] sm:$0xff]  }
   0x7   :  { %v1224_v14 = vld [vmem:[%s1692_s1 + $0x18] sm:$0xff]   ;;  %v1228_v18 = vld [vmem:[%s1692_s1 + $0x20] sm:$0xff]   ;;  %v1232_v22 = vld [vmem:[%s1692_s1 + $0x28] sm:$0xff]  }
   0x8   :  { %1041 = vmatpush3.bf16.msra.mxu0 %v1216_v6  ;;  %v1225_v15 = vld [vmem:[%s1692_s1 + $0x98] sm:$0xff]   ;;  %v1229_v19 = vld [vmem:[%s1692_s1 + $0xa0] sm:$0xff]   ;;  %v1233_v23 = vld [vmem:[%s1692_s1 + $0xa8] sm:$0xff]  }
   0x9   :  { %1105 = vmatpush3.bf16.msra.mxu1 %v1217_v7  ;;  %1042 = vmatprep.subr.bf16.mxu0 %v1218_v8  ;;  %v1234_v24 = vld [vmem:[%s1692_s1 + $0x70] sm:$0xff]   ;;  %v1238_v28 = vld [vmem:[%s1692_s1 + $0x78] sm:$0xff]   ;;  %v1247_v35 = vld [vmem:[%s1693_s0 + $0xc] ss:$20 sps:$4 sm:$0xff]  }
   0xa   :  { %1106 = vmatprep.subr.bf16.mxu1 %v1219_v9  ;;  %v1235_v25 = vld [vmem:[%s1692_s1 + $0xf0] sm:$0xff]   ;;  %v1239_v29 = vld [vmem:[%s1692_s1 + $0xf8] sm:$0xff]   ;;  %v1248_v36 = vld [vmem:[%s1692_s1 + $0x100] sm:$0xff]   ;;  %716 = vmatprep.mubr.bf16.mxu1 %v1247_v35 }
   0xb   :  { %v1236_v26 = vld [vmem:[%s1692_s1 + $0x30] sm:$0xff]   ;;  %v1240_v30 = vld [vmem:[%s1692_s1 + $0x38] sm:$0xff]   ;;  %v1249_v37 = vld [vmem:[%s1693_s0 + $0x2c] ss:$20 sps:$4 sm:$0xff]  }
   0xc   :  { %1043 = vmatpush3.bf16.msra.mxu0 %v1220_v10  ;;  %v1237_v27 = vld [vmem:[%s1692_s1 + $0xb0] sm:$0xff]   ;;  %v1241_v31 = vld [vmem:[%s1692_s1 + $0xb8] sm:$0xff]   ;;  %v1261_v42 = vld [vmem:[%s1692_s1 + $0x108] sm:$0xff]  }
   0xd   :  { %1107 = vmatpush3.bf16.msra.mxu1 %v1221_v11  ;;  %1044 = vmatprep.subr.bf16.mxu0 %v1222_v12  ;;  %v1242_v32 = vld [vmem:[%s1693_s0] ss:$20 sps:$4 sm:$0xff]   ;;  %v1244_v33 = vld [vmem:[%s1693_s0 + $0x4] ss:$20 sps:$4 sm:$0xff]   ;;  %v1245_v34 = vld [vmem:[%s1693_s0 + $0x8] ss:$20 sps:$4 sm:$0xff]  }
   0xe   :  { %1108 = vmatprep.subr.bf16.mxu1 %v1223_v13  ;;  %619 = vmatprep.mubr.bf16.mxu0 %v1244_v33  ;;  %v1251_v38 = vld [vmem:[%s1693_s0 + $0x34] ss:$20 sps:$4 sm:$0xff]   ;;  %v1254_v40 = vld [vmem:[%s1693_s0 + $0x30] ss:$20 sps:$4 sm:$0xff]   ;;  %v1260_v45 = vld [vmem:[%s1693_s0 + $0x58] ss:$20 sps:$4 sm:$0xff]  }
   0xf   :  { %v1253_v39 = vld [vmem:[%s1693_s0 + $0x28] ss:$20 sps:$4 sm:$0xff]   ;;  %v1259_v44 = vld [vmem:[%s1693_s0 + $0x50] ss:$20 sps:$4 sm:$0xff]   ;;  %v1266_v50 = vld [vmem:[%s1693_s0 + $0x78] ss:$20 sps:$4 sm:$0xff]  }
  0x10   :  { %1045 = vmatpush3.bf16.msra.mxu0 %v1224_v14  ;;  %v1255_v41 = vld [vmem:[%s1693_s0 + $0x54] ss:$20 sps:$4 sm:$0xff]   ;;  %v1257_v43 = vld [vmem:[%s1693_s0 + $0x5c] ss:$20 sps:$4 sm:$0xff]   ;;  %v1264_v48 = vld [vmem:[%s1693_s0 + $0x84] ss:$20 sps:$4 sm:$0xff]  }
  0x11   :  { %1109 = vmatpush3.bf16.msra.mxu1 %v1225_v15  ;;  %1046 = vmatprep.subr.bf16.mxu0 %v1226_v16  ;;  %v1274_v46 = vld [vmem:[%s1692_s1 + $0x110] sm:$0xff]   ;;  %v1287_v49 = vld [vmem:[%s1692_s1 + $0x118] sm:$0xff]   ;;  %v1270_v53 = vld [vmem:[%s1693_s0 + $0xac] ss:$20 sps:$4 sm:$0xff]  }
  0x12   :  { %1110 = vmatprep.subr.bf16.mxu1 %v1227_v17  ;;  %v1262_v47 = vld [vmem:[%s1693_s0 + $0x7c] ss:$20 sps:$4 sm:$0xff]   ;;  %v1267_v51 = vld [vmem:[%s1693_s0 + $0x80] ss:$20 sps:$4 sm:$0xff]   ;;  %v1268_v52 = vld [vmem:[%s1693_s0 + $0xa4] ss:$20 sps:$4 sm:$0xff]  }
  0x13   :  { %v1272_v54 = vld [vmem:[%s1693_s0 + $0xa0] ss:$20 sps:$4 sm:$0xff]   ;;  %v1273_v55 = vld [vmem:[%s1693_s0 + $0xa8] ss:$20 sps:$4 sm:$0xff]   ;;  %v1280_v59 = vld [vmem:[%s1693_s0 + $0xd0] ss:$20 sps:$4 sm:$0xff]  }
  0x14   :  { %1047 = vmatpush3.bf16.msra.mxu0 %v1228_v18  ;;  %v1275_v56 = vld [vmem:[%s1693_s0 + $0xcc] ss:$20 sps:$4 sm:$0xff]   ;;  %v1277_v57 = vld [vmem:[%s1693_s0 + $0xd4] ss:$20 sps:$4 sm:$0xff]   ;;  %v1283_v61 = vld [vmem:[%s1693_s0 + $0xfc] ss:$20 sps:$4 sm:$0xff]  }
  0x15   :  { %1111 = vmatpush3.bf16.msra.mxu1 %v1229_v19  ;;  %1048 = vmatprep.subr.bf16.mxu0 %v1230_v20  ;;  %v1279_v58 = vld [vmem:[%s1693_s0 + $0xc8] ss:$20 sps:$4 sm:$0xff]   ;;  %v1285_v62 = vld [vmem:[%s1693_s0 + $0xf0] ss:$20 sps:$4 sm:$0xff]   ;;  %v1286_v63 = vld [vmem:[%s1693_s0 + $0xf8] ss:$20 sps:$4 sm:$0xff]  }
  0x16   :  { %1112 = vmatprep.subr.bf16.mxu1 %v1231_v21  ;;  %v1281_v60 = vld [vmem:[%s1693_s0 + $0xf4] ss:$20 sps:$4 sm:$0xff]   ;;  %v1288_v0 = vld [vmem:[%s1693_s0 + $0x11c] ss:$20 sps:$4 sm:$0xff]   ;;  %v1290_v1 = vld [vmem:[%s1693_s0 + $0x124] ss:$20 sps:$4 sm:$0xff]  }
  0x17   :  { %v1292_v2 = vld [vmem:[%s1693_s0 + $0x118] ss:$20 sps:$4 sm:$0xff]   ;;  %v1293_v3 = vld [vmem:[%s1693_s0 + $0x120] ss:$20 sps:$4 sm:$0xff]   ;;  %v1294_v4 = vld [vmem:[%s1693_s0 + $0x10] ss:$20 sps:$4 sm:$0xff]  }
  0x18   :  { %1049 = vmatpush3.bf16.msra.mxu0 %v1232_v22  ;;  %v1295_v5 = vld [vmem:[%s1693_s0 + $0xb0] ss:$20 sps:$4 sm:$0xff]   ;;  %v1296_v6 = vld [vmem:[%s1693_s0 + $0x38] ss:$20 sps:$4 sm:$0xff]   ;;  %v1298_v8 = vld [vmem:[%s1693_s0 + $0x60] ss:$20 sps:$4 sm:$0xff]  }
  0x19   :  { %1113 = vmatpush3.bf16.msra.mxu1 %v1233_v23  ;;  %1050 = vmatprep.subr.bf16.mxu0 %v1234_v24  ;;  %v1297_v7 = vld [vmem:[%s1693_s0 + $0xd8] ss:$20 sps:$4 sm:$0xff]   ;;  %v1299_v9 = vld [vmem:[%s1693_s0 + $0x100] ss:$20 sps:$4 sm:$0xff]   ;;  %v1300_v10 = vld [vmem:[%s1693_s0 + $0x88] ss:$20 sps:$4 sm:$0xff]  }
  0x1a   :  { %1114 = vmatprep.subr.bf16.mxu1 %v1235_v25  ;;  %v1301_v11 = vld [vmem:[%s1693_s0 + $0x128] ss:$20 sps:$4 sm:$0xff]   ;;  %v1566_v14 = vld [vmem:[%s1694_s2] ss:$0 sm:$0xff] }
  0x1c   :  { %1051 = vmatpush3.bf16.msra.mxu0 %v1236_v26 }
  0x1d   :  { %1115 = vmatpush3.bf16.msra.mxu1 %v1237_v27  ;;  %1052 = vmatprep.subr.bf16.mxu0 %v1238_v28 }
  0x1e   :  { %1116 = vmatprep.subr.bf16.mxu1 %v1239_v29 }
  0x20   :  { %1053 = vmatpush3.bf16.msra.mxu0 %v1240_v30 }
  0x21   :  { %1117 = vmatpush3.bf16.msra.mxu1 %v1241_v31  ;;  %1178 = vmatprep.subr.bf16.mxu0 %v1248_v36 }
  0x22   :  { %1202 = vmatprep.subr.bf16.mxu1 %v1248_v36 }
  0x23   :  { %620 = vmatmul.mubr.bf16.vlgmr.msra.gmra.mrb[0].mxu0 %v1242_v32 }
  0x24   :  { %717 = vmatmul.mubr.bf16.vlgmr.msra.gmra.mrb[0].mxu1 %v1245_v34  ;;  %1179 = vmatpush3.bf16.msra.mxu0 %v1248_v36 }
  0x25   :  { %1206 = vmatpush3.bf16.msra.mxu1 %v1248_v36  ;;  %627 = vmatprep.mubr.bf16.mxu0 %v1249_v37 }
  0x26   :  { %724 = vmatprep.mubr.bf16.mxu1 %v1251_v38  ;;  %1180 = vmatprep.subr.bf16.mxu0 %v1261_v42 }
  0x27   :  { %1203 = vmatprep.subr.bf16.mxu1 %v1261_v42 }
  0x28   :  { %1181 = vmatpush3.bf16.msra.mxu0 %v1261_v42 }
  0x29   :  { %1207 = vmatpush3.bf16.msra.mxu1 %v1261_v42  ;;  %1182 = vmatprep.subr.bf16.mxu0 %v1274_v46 }
  0x2a   :  { %1204 = vmatprep.subr.bf16.mxu1 %v1274_v46 }
  0x2b   :  { %628 = vmatmul.mubr.bf16.gmra.mrb[4].mxu0 %v1253_v39 }
  0x2c   :  { %725 = vmatmul.mubr.bf16.gmra.mrb[4].mxu1 %v1254_v40  ;;  %635 = vmatprep.mubr.bf16.mxu0 %v1255_v41 }
  0x2d   :  { %732 = vmatprep.mubr.bf16.mxu1 %v1257_v43  ;;  %1183 = vmatpush3.bf16.msra.mxu0 %v1274_v46 }
  0x2e   :  { %1208 = vmatpush3.bf16.msra.mxu1 %v1274_v46  ;;  %1184 = vmatprep.subr.bf16.mxu0 %v1287_v49 }
  0x2f   :  { %1205 = vmatprep.subr.bf16.mxu1 %v1287_v49 }
  0x31   :  { %1185 = vmatpush3.bf16.msra.mxu0 %v1287_v49 }
  0x32   :  { %1209 = vmatpush3.bf16.msra.mxu1 %v1287_v49 }
  0x33   :  { %636 = vmatmul.mubr.bf16.gmra.mrb[8].mxu0 %v1259_v44 }
  0x34   :  { %733 = vmatmul.mubr.bf16.gmra.mrb[8].mxu1 %v1260_v45  ;;  %643 = vmatprep.mubr.bf16.mxu0 %v1262_v47 }
  0x35   :  { %740 = vmatprep.mubr.bf16.mxu1 %v1264_v48 }
  0x3b   :  { %644 = vmatmul.mubr.bf16.gmra.mrb[12].mxu0 %v1266_v50 }
  0x3c   :  { %741 = vmatmul.mubr.bf16.gmra.mrb[12].mxu1 %v1267_v51  ;;  %651 = vmatprep.mubr.bf16.mxu0 %v1268_v52 }
  0x3d   :  { %748 = vmatprep.mubr.bf16.mxu1 %v1270_v53 }
  0x43   :  { %652 = vmatmul.mubr.bf16.gmra.mrb[16].mxu0 %v1272_v54 }
  0x44   :  { %749 = vmatmul.mubr.bf16.gmra.mrb[16].mxu1 %v1273_v55  ;;  %659 = vmatprep.mubr.bf16.mxu0 %v1275_v56 }
  0x45   :  { %756 = vmatprep.mubr.bf16.mxu1 %v1277_v57 }
  0x4b   :  { %660 = vmatmul.mubr.bf16.gmra.mrb[20].mxu0 %v1279_v58 }
  0x4c   :  { %757 = vmatmul.mubr.bf16.gmra.mrb[20].mxu1 %v1280_v59  ;;  %667 = vmatprep.mubr.bf16.mxu0 %v1281_v60 }
  0x4d   :  { %764 = vmatprep.mubr.bf16.mxu1 %v1283_v61 }
  0x53   :  { %668 = vmatmul.mubr.bf16.gmra.mrb[24].mxu0 %v1285_v62 }
  0x54   :  { %765 = vmatmul.mubr.bf16.gmra.mrb[24].mxu1 %v1286_v63  ;;  %675 = vmatprep.mubr.bf16.mxu0 %v1288_v0 }
  0x55   :  { %772 = vmatprep.mubr.bf16.mxu1 %v1290_v1 }
  0x5b   :  { %676 = vmatmul.mubr.bf16.gmra.mrb[28].mxu0 %v1292_v2 }
  0x5c   :  { %773 = vmatmul.mubr.bf16.gmra.mrb[28].mxu1 %v1293_v3  ;;  %1186 = vmatprep.mubr.msk.bf16.mxu0 %vm562_vm0, %v1294_v4 }
  0x5d   :  { %1194 = vmatprep.mubr.msk.bf16.mxu1 %vm562_vm0, %v1295_v5 }
  0x63   :  { %1187 = vmatmul.mubr.msk.bf16.vlgmr.msra.gmra.mrb[32].mxu0 %vm562_vm0, %v1296_v6 }
  0x64   :  { %1195 = vmatmul.mubr.msk.bf16.vlgmr.msra.gmra.mrb[32].mxu1 %vm562_vm0, %v1297_v7  ;;  %1190 = vmatprep.mubr.msk.bf16.mxu0 %vm562_vm0, %v1298_v8 }
  0x65   :  { %1198 = vmatprep.mubr.msk.bf16.mxu1 %vm562_vm0, %v1299_v9 }
  0x6b   :  { %1191 = vmatmul.mubr.msk.bf16.gmra.mrb[36].mxu0 %vm562_vm0, %v1300_v10 }
  0x6c   :  { %1199 = vmatmul.mubr.msk.bf16.gmra.mrb[36].mxu1 %vm562_vm0, %v1301_v11 }
  0xf6   :  { %v1054_v12 = vpop.f32.mrb[0].mxu0 }
  0xf7   :  { %v1118_v13 = vpop.f32.mrb[0].mxu1  ;;  %v1055_v15 = vpop.f32.mrb[1].mxu0 }
  0xf8   :  { %v1056_v16 = vadd.f32 %v1055_v15, %v1054_v12  ;;  %v1119_v17 = vpop.f32.mrb[1].mxu1  ;;  %v1057_v18 = vpop.f32.mrb[2].mxu0 }
  0xf9   :  { %v1120_v19 = vadd.f32 %v1119_v17, %v1118_v13  ;;  %v1121_v20 = vpop.f32.mrb[2].mxu1  ;;  %v1058_v21 = vpop.f32.mrb[3].mxu0 }
  0xfa   :  { %v622_v22 = vadd.f32 %v1056_v16, %v1566_v14  ;;  %v1059_v23 = vadd.f32 %v1058_v21, %v1057_v18  ;;  %v1122_v24 = vpop.f32.mrb[3].mxu1 }
  0xfb   :  { %v1123_v25 = vadd.f32 %v1122_v24, %v1121_v20 }
  0xfc   :  { %v625_v26 = vadd.f32 %v1059_v23, %v1566_v14  ;;  %v1570_v27 = vadd.f32 %v1120_v19, %v622_v22 }
  0xfe   :  { %v1060_v28 = vpop.f32.mrb[4].mxu0  ;;  %v1572_v29 = vadd.f32 %v1123_v25, %v625_v26 }
  0xff   :  { %v1124_v30 = vpop.f32.mrb[4].mxu1  ;;  %v1061_v31 = vpop.f32.mrb[5].mxu0 }
 0x100   :  { %v1062_v32 = vadd.f32 %v1061_v31, %v1060_v28  ;;  %v1125_v33 = vpop.f32.mrb[5].mxu1  ;;  %v1063_v34 = vpop.f32.mrb[6].mxu0 }
 0x101   :  { %v1126_v35 = vadd.f32 %v1125_v33, %v1124_v30  ;;  %v1127_v36 = vpop.f32.mrb[6].mxu1  ;;  %v1064_v37 = vpop.f32.mrb[7].mxu0 }
 0x102   :  { %v630_v38 = vadd.f32 %v1062_v32, %v1566_v14  ;;  %v1065_v39 = vadd.f32 %v1064_v37, %v1063_v34  ;;  %v1128_v40 = vpop.f32.mrb[7].mxu1 }
 0x103   :  { %v1129_v41 = vadd.f32 %v1128_v40, %v1127_v36 }
 0x104   :  { %v633_v42 = vadd.f32 %v1065_v39, %v1566_v14  ;;  %v1576_v43 = vadd.f32 %v1126_v35, %v630_v38 }
 0x106   :  { %v1066_v44 = vpop.f32.mrb[8].mxu0  ;;  %v1578_v45 = vadd.f32 %v1129_v41, %v633_v42 }
 0x107   :  { %v1130_v46 = vpop.f32.mrb[8].mxu1  ;;  %v1067_v47 = vpop.f32.mrb[9].mxu0 }
 0x108   :  { %v1068_v48 = vadd.f32 %v1067_v47, %v1066_v44  ;;  %v1131_v49 = vpop.f32.mrb[9].mxu1  ;;  %v1069_v50 = vpop.f32.mrb[10].mxu0 }
 0x109   :  { %v1132_v51 = vadd.f32 %v1131_v49, %v1130_v46  ;;  %v1133_v52 = vpop.f32.mrb[10].mxu1  ;;  %v1070_v53 = vpop.f32.mrb[11].mxu0 }
 0x10a   :  { %v638_v54 = vadd.f32 %v1068_v48, %v1566_v14  ;;  %v1071_v55 = vadd.f32 %v1070_v53, %v1069_v50  ;;  %v1134_v56 = vpop.f32.mrb[11].mxu1 }
 0x10b   :  { %v1135_v57 = vadd.f32 %v1134_v56, %v1133_v52 }
 0x10c   :  { %v641_v58 = vadd.f32 %v1071_v55, %v1566_v14  ;;  %v1582_v59 = vadd.f32 %v1132_v51, %v638_v54 }
 0x10e   :  { %v1072_v60 = vpop.f32.mrb[12].mxu0  ;;  %v1584_v61 = vadd.f32 %v1135_v57, %v641_v58 }
 0x10f   :  { %v1136_v62 = vpop.f32.mrb[12].mxu1  ;;  %v1073_v63 = vpop.f32.mrb[13].mxu0 }
 0x110   :  { %v1074_v0 = vadd.f32 %v1073_v63, %v1072_v60  ;;  %v1137_v1 = vpop.f32.mrb[13].mxu1  ;;  %v1075_v2 = vpop.f32.mrb[14].mxu0 }
 0x111   :  { %v1138_v3 = vadd.f32 %v1137_v1, %v1136_v62  ;;  %v1139_v4 = vpop.f32.mrb[14].mxu1  ;;  %v1076_v5 = vpop.f32.mrb[15].mxu0 }
 0x112   :  { %v646_v6 = vadd.f32 %v1074_v0, %v1566_v14  ;;  %v1077_v7 = vadd.f32 %v1076_v5, %v1075_v2  ;;  %v1140_v8 = vpop.f32.mrb[15].mxu1 }
 0x113   :  { %v1141_v9 = vadd.f32 %v1140_v8, %v1139_v4 }
 0x114   :  { %v649_v10 = vadd.f32 %v1077_v7, %v1566_v14  ;;  %v1588_v11 = vadd.f32 %v1138_v3, %v646_v6 }
 0x116   :  { %v1078_v12 = vpop.f32.mrb[16].mxu0  ;;  %v1590_v13 = vadd.f32 %v1141_v9, %v649_v10 }
 0x117   :  { %v1142_v15 = vpop.f32.mrb[16].mxu1  ;;  %v1079_v16 = vpop.f32.mrb[17].mxu0 }
 0x118   :  { %v1080_v17 = vadd.f32 %v1079_v16, %v1078_v12  ;;  %v1143_v18 = vpop.f32.mrb[17].mxu1  ;;  %v1081_v19 = vpop.f32.mrb[18].mxu0 }
 0x119   :  { %v1144_v20 = vadd.f32 %v1143_v18, %v1142_v15  ;;  %v1145_v21 = vpop.f32.mrb[18].mxu1  ;;  %v1082_v22 = vpop.f32.mrb[19].mxu0 }
 0x11a   :  { %v654_v23 = vadd.f32 %v1080_v17, %v1566_v14  ;;  %v1083_v24 = vadd.f32 %v1082_v22, %v1081_v19  ;;  %v1146_v25 = vpop.f32.mrb[19].mxu1  ;;  %v1611_v22 = vld [vmem:[%s1695_s3] ss:$0 sm:$0xff] }
 0x11b   :  { %v1147_v26 = vadd.f32 %v1146_v25, %v1145_v21 }
 0x11c   :  { %v657_v28 = vadd.f32 %v1083_v24, %v1566_v14  ;;  %v1594_v30 = vadd.f32 %v1144_v20, %v654_v23 }
 0x11e   :  { %v1084_v31 = vpop.f32.mrb[20].mxu0  ;;  %v1596_v32 = vadd.f32 %v1147_v26, %v657_v28 }
 0x11f   :  { %v1148_v33 = vpop.f32.mrb[20].mxu1  ;;  %v1085_v34 = vpop.f32.mrb[21].mxu0 }
 0x120   :  { %v1086_v35 = vadd.f32 %v1085_v34, %v1084_v31  ;;  %v1149_v36 = vpop.f32.mrb[21].mxu1  ;;  %v1087_v37 = vpop.f32.mrb[22].mxu0 }
 0x121   :  { %v1150_v38 = vadd.f32 %v1149_v36, %v1148_v33  ;;  %v1151_v39 = vpop.f32.mrb[22].mxu1  ;;  %v1088_v40 = vpop.f32.mrb[23].mxu0 }
 0x122   :  { %v662_v41 = vadd.f32 %v1086_v35, %v1566_v14  ;;  %v1089_v42 = vadd.f32 %v1088_v40, %v1087_v37  ;;  %v1152_v44 = vpop.f32.mrb[23].mxu1 }
 0x123   :  { %v1153_v46 = vadd.f32 %v1152_v44, %v1151_v39 }
 0x124   :  { %v665_v47 = vadd.f32 %v1089_v42, %v1566_v14  ;;  %v759_v48 = vadd.f32 %v1150_v38, %v662_v41 }
 0x126   :  { %v1090_v49 = vpop.f32.mrb[24].mxu0  ;;  %v762_v50 = vadd.f32 %v1153_v46, %v665_v47 }
 0x127   :  { %v1154_v51 = vpop.f32.mrb[24].mxu1  ;;  %v1091_v52 = vpop.f32.mrb[25].mxu0 }
 0x128   :  { %v1092_v53 = vadd.f32 %v1091_v52, %v1090_v49  ;;  %v1155_v54 = vpop.f32.mrb[25].mxu1  ;;  %v1093_v55 = vpop.f32.mrb[26].mxu0 }
 0x129   :  { %v1156_v56 = vadd.f32 %v1155_v54, %v1154_v51  ;;  %v1157_v57 = vpop.f32.mrb[26].mxu1  ;;  %v1094_v58 = vpop.f32.mrb[27].mxu0 }
 0x12a   :  { %v670_v60 = vadd.f32 %v1092_v53, %v1566_v14  ;;  %v1095_v62 = vadd.f32 %v1094_v58, %v1093_v55  ;;  %v1158_v63 = vpop.f32.mrb[27].mxu1 }
 0x12b   :  { %v1159_v0 = vadd.f32 %v1158_v63, %v1157_v57 }
 0x12c   :  { %v673_v1 = vadd.f32 %v1095_v62, %v1566_v14  ;;  %v1602_v2 = vadd.f32 %v1156_v56, %v670_v60 }
 0x12e   :  { %v1096_v3 = vpop.f32.mrb[28].mxu0  ;;  %v1604_v4 = vadd.f32 %v1159_v0, %v673_v1 }
 0x12f   :  { %v1160_v5 = vpop.f32.mrb[28].mxu1  ;;  %v1097_v6 = vpop.f32.mrb[29].mxu0 }
 0x130   :  { %v1098_v7 = vadd.f32 %v1097_v6, %v1096_v3  ;;  %v1161_v8 = vpop.f32.mrb[29].mxu1  ;;  %v1099_v9 = vpop.f32.mrb[30].mxu0 }
 0x131   :  { %v1162_v10 = vadd.f32 %v1161_v8, %v1160_v5  ;;  %v1163_v12 = vpop.f32.mrb[30].mxu1  ;;  %v1100_v15 = vpop.f32.mrb[31].mxu0 }
 0x132   :  { %v678_v16 = vadd.f32 %v1098_v7, %v1566_v14  ;;  %v1101_v17 = vadd.f32 %v1100_v15, %v1099_v9  ;;  %v1164_v18 = vpop.f32.mrb[31].mxu1 }
 0x133   :  { %v1165_v19 = vadd.f32 %v1164_v18, %v1163_v12 }
 0x134   :  { %v681_v20 = vadd.f32 %v1101_v17, %v1566_v14  ;;  %v775_v21 = vadd.f32 %v1162_v10, %v678_v16 }
 0x136   :  { %v1188_v23 = vpop.f32.mrb[32].mxu0  ;;  %v1613_v24 = vadd.f32 %v1165_v19, %v681_v20 }
 0x137   :  { %v824_v25 = vadd.f32 %v1188_v23, %v1576_v43  ;;  %v1196_v26 = vpop.f32.mrb[32].mxu1  ;;  %v815_v28 = vpop.f32.mrb[33].mxu0 }
 0x138   :  { %v856_v31 = vadd.f32 %v1196_v26, %v759_v48  ;;  %v816_v33 = vadd.f32 %v815_v28, %v1570_v27  ;;  %v847_v34 = vpop.f32.mrb[33].mxu1  ;;  %v1189_v35 = vpop.f32.mrb[34].mxu0 }
 0x139   :  { %vm880_vm1 = vcmp.ge.f32.partialorder %v824_v25, 0.0  ;;  %v902_v14 = vmul.f32 %v1611_v22, %v824_v25  ;;  %v848_v36 = vadd.f32 %v847_v34, %v1594_v30  ;;  %v827_v37 = vadd.f32 %v1189_v35, %v1578_v45  ;;  %v1197_v38 = vpop.f32.mrb[34].mxu1  ;;  %v818_v39 = vpop.f32.mrb[35].mxu0 }
 0x13a   :  { %vm888_vm2 = vcmp.ge.f32.partialorder %v856_v31, 0.0  ;;  %v910_v40 = vmul.f32 %v1611_v22, %v856_v31  ;;  %vm878_vm3 = vcmp.ge.f32.partialorder %v816_v33, 0.0  ;;  %v900_v43 = vmul.f32 %v1611_v22, %v816_v33  ;;  %v850_v41 = vpop.f32.mrb[35].mxu1 }
 0x13b   :  { %v918_v42 = vsel %vm880_vm1, %v824_v25, %v902_v14  ;;  %vm886_vm4 = vcmp.ge.f32.partialorder %v848_v36, 0.0  ;;  %v908_v27 = vmul.f32 %v1611_v22, %v848_v36  ;;  %vm881_vm5 = vcmp.ge.f32.partialorder %v827_v37, 0.0 }
 0x13c   :  { %934 = vst [vmem:[%s1696_s4 + $0x10] sm:$0xff] %v918_v42  ;;  %v926_v30 = vsel %vm888_vm2, %v856_v31, %v910_v40  ;;  %v916_v45 = vsel %vm878_vm3, %v816_v33, %v900_v43  ;;  %v903_v44 = vmul.f32 %v1611_v22, %v827_v37  ;;  %v859_v46 = vadd.f32 %v1197_v38, %v762_v50 }
 0x13d   :  { %942 = vst [vmem:[%s1696_s4 + $0x50] sm:$0xff] %v926_v30  ;;  %932 = vst [vmem:[%s1696_s4] sm:$0xff] %v916_v45  ;;  %v924_v47 = vsel %vm886_vm4, %v848_v36, %v908_v27  ;;  %v819_v48 = vadd.f32 %v818_v39, %v1572_v29  ;;  %v851_v49 = vadd.f32 %v850_v41, %v1596_v32 }
 0x13e   :  { %940 = vst [vmem:[%s1696_s4 + $0x40] sm:$0xff] %v924_v47  ;;  %v919_v51 = vsel %vm881_vm5, %v827_v37, %v903_v44  ;;  %vm889_vm6 = vcmp.ge.f32.partialorder %v859_v46, 0.0  ;;  %v911_v50 = vmul.f32 %v1611_v22, %v859_v46  ;;  %v1192_v52 = vpop.f32.mrb[36].mxu0 }
 0x13f   :  { %935 = vst [vmem:[%s1696_s4 + $0x18] sm:$0xff] %v919_v51  ;;  %vm879_vm7 = vcmp.ge.f32.partialorder %v819_v48, 0.0  ;;  %v901_v53 = vmul.f32 %v1611_v22, %v819_v48  ;;  %vm887_vm8 = vcmp.ge.f32.partialorder %v851_v49, 0.0  ;;  %v909_v29 = vmul.f32 %v1611_v22, %v851_v49  ;;  %v1200_v32 = vpop.f32.mrb[36].mxu1  ;;  %v831_v54 = vpop.f32.mrb[37].mxu0 }
 0x140   :  { %v927_v55 = vsel %vm889_vm6, %v859_v46, %v911_v50  ;;  %v840_v56 = vadd.f32 %v1192_v52, %v1588_v11  ;;  %v872_v57 = vadd.f32 %v1200_v32, %v775_v21  ;;  %v832_v58 = vadd.f32 %v831_v54, %v1582_v59  ;;  %v863_v60 = vpop.f32.mrb[37].mxu1  ;;  %v1193_v62 = vpop.f32.mrb[38].mxu0 }
 0x141   :  { %943 = vst [vmem:[%s1696_s4 + $0x58] sm:$0xff] %v927_v55  ;;  %v917_v63 = vsel %vm879_vm7, %v819_v48, %v901_v53  ;;  %v925_v0 = vsel %vm887_vm8, %v851_v49, %v909_v29  ;;  %v864_v1 = vadd.f32 %v863_v60, %v1602_v2  ;;  %v843_v3 = vadd.f32 %v1193_v62, %v1590_v13  ;;  %v1201_v5 = vpop.f32.mrb[38].mxu1  ;;  %v834_v6 = vpop.f32.mrb[39].mxu0 }
 0x142   :  { %933 = vst [vmem:[%s1696_s4 + $0x8] sm:$0xff] %v917_v63  ;;  %941 = vst [vmem:[%s1696_s4 + $0x48] sm:$0xff] %v925_v0  ;;  %vm884_vm9 = vcmp.ge.f32.partialorder %v840_v56, 0.0  ;;  %v906_v59 = vmul.f32 %v1611_v22, %v840_v56  ;;  %vm892_vm10 = vcmp.ge.f32.partialorder %v872_v57, 0.0  ;;  %v914_v11 = vmul.f32 %v1611_v22, %v872_v57  ;;  %v866_v7 = vpop.f32.mrb[39].mxu1 }
 0x143   :  { %vm882_vm11 = vcmp.ge.f32.partialorder %v832_v58, 0.0  ;;  %v904_v13 = vmul.f32 %v1611_v22, %v832_v58  ;;  %vm890_vm12 = vcmp.ge.f32.partialorder %v864_v1, 0.0  ;;  %v912_v2 = vmul.f32 %v1611_v22, %v864_v1 }
 0x144   :  { %v922_v8 = vsel %vm884_vm9, %v840_v56, %v906_v59  ;;  %v930_v9 = vsel %vm892_vm10, %v872_v57, %v914_v11  ;;  %vm885_vm13 = vcmp.ge.f32.partialorder %v843_v3, 0.0  ;;  %v907_v10 = vmul.f32 %v1611_v22, %v843_v3 }
 0x145   :  { %938 = vst [vmem:[%s1696_s4 + $0x30] sm:$0xff] %v922_v8  ;;  %946 = vst [vmem:[%s1696_s4 + $0x70] sm:$0xff] %v930_v9  ;;  %v920_v12 = vsel %vm882_vm11, %v832_v58, %v904_v13  ;;  %v928_v15 = vsel %vm890_vm12, %v864_v1, %v912_v2  ;;  %v875_v16 = vadd.f32 %v1201_v5, %v1613_v24 }
 0x146   :  { %v835_v17 = vadd.f32 %v834_v6, %v1584_v61  ;;  %936 = vst [vmem:[%s1696_s4 + $0x20] sm:$0xff] %v920_v12  ;;  %944 = vst [vmem:[%s1696_s4 + $0x60] sm:$0xff] %v928_v15  ;;  %v923_v18 = vsel %vm885_vm13, %v843_v3, %v907_v10  ;;  %v867_v19 = vadd.f32 %v866_v7, %v1604_v4 }
 0x147   :  { %939 = vst [vmem:[%s1696_s4 + $0x38] sm:$0xff] %v923_v18  ;;  %vm893_vm14 = vcmp.ge.f32.partialorder %v875_v16, 0.0  ;;  %v915_v20 = vmul.f32 %v1611_v22, %v875_v16 }
 0x148   :  { %vm883_vm15 = vcmp.ge.f32.partialorder %v835_v17, 0.0  ;;  %v905_v61 = vmul.f32 %v1611_v22, %v835_v17  ;;  %vm891_vm0 = vcmp.ge.f32.partialorder %v867_v19, 0.0  ;;  %v913_v21 = vmul.f32 %v1611_v22, %v867_v19 }
 0x149   :  { %v931_v23 = vsel %vm893_vm14, %v875_v16, %v915_v20 }
 0x14a   :  { %v921_v24 = vsel %vm883_vm15, %v835_v17, %v905_v61  ;;  %947 = vst [vmem:[%s1696_s4 + $0x78] sm:$0xff] %v931_v23  ;;  %v929_v4 = vsel %vm891_vm0, %v867_v19, %v913_v21 }
 0x14b   :  { %937 = vst [vmem:[%s1696_s4 + $0x28] sm:$0xff] %v921_v24  ;;  %945 = vst [vmem:[%s1696_s4 + $0x68] sm:$0xff] %v929_v4 }

// kernel: fwd.5
= control target key start
LH: loop header
LB: loop body
LE: loop exit
PB: predicated region body
PF: predicated region fallthrough
CT: control target
= control target key end

     0   :  { %s230_s0 = inlined_call_operand.vmem [shape: f32[2,32,128], index: 0, kind: input, shape index: {}]   ;;  %s231_s1 = inlined_call_operand.vmem [shape: bf16[2,32,128], index: 1, kind: input, shape index: {}]   ;;  %s232_s2 = inlined_call_operand.vmem [shape: f32[2,1,128], index: 2, kind: input, shape index: {}]   ;;  %s233_s3 = inlined_call_operand.vmem [shape: f32[1,1,128], index: 3, kind: input, shape index: {}]   ;;  %s234_s4 = inlined_call_operand.vmem [shape: f32[2,32,128], index: 4, kind: output, shape index: {}]  }
   0x1   :  { %v17_v0 = vld [vmem:[%s230_s0] sm:$0xff]  ;;  %v18_v6 = vld [vmem:[%s230_s0 + $0x8] sm:$0xff]  ;;  %v19_v8 = vld [vmem:[%s230_s0 + $0x10] sm:$0xff] }
   0x2   :  { %v114_v1 = vld [vmem:[%s232_s2] ss:$0 sm:$0xff]  ;;  %v133_v11 = vld [vmem:[%s231_s1 + $0x8] sm:$0xff]   ;;  %v20_v12 = vld [vmem:[%s230_s0 + $0x18] sm:$0xff] }
   0x3   :  { %v118_v2 = vld [vmem:[%s231_s1] sm:$0xff]   ;;  %v39_v3 = vmul.f32 %v114_v1, %v17_v0  ;;  %v40_v9 = vmul.f32 %v114_v1, %v18_v6  ;;  %v41_v10 = vmul.f32 %v114_v1, %v19_v8  ;;  %v123_v15 = vunpack.c.l.bf16 %v133_v11  ;;  %v134_v19 = vld [vmem:[%s231_s1 + $0x10] sm:$0xff]   ;;  %v22_v20 = vld [vmem:[%s230_s0 + $0x28] sm:$0xff] }
   0x4   :  { %v119_v4 = vunpack.c.l.bf16 %v118_v2  ;;  %v116_v5 = vld [vmem:[%s233_s3] ss:$0 sm:$0xff]  ;;  %v120_v7 = vunpack.c.h.bf16 %v118_v2  ;;  %v42_v16 = vmul.f32 %v114_v1, %v20_v12  ;;  %v124_v17 = vunpack.c.h.bf16 %v133_v11  ;;  %v115_v18 = vld [vmem:[%s232_s2 + $0x1] ss:$0 sm:$0xff]  ;;  %v23_v31 = vld [vmem:[%s230_s0 + $0x30] sm:$0xff] }
   0x5   :  { %v21_v13 = vld [vmem:[%s230_s0 + $0x20] sm:$0xff]  ;;  %v127_v23 = vunpack.c.l.bf16 %v134_v19  ;;  %v44_v24 = vmul.f32 %v115_v18, %v22_v20  ;;  %v65_v26 = vadd.f32 %v123_v15, %v41_v10  ;;  %v128_v30 = vunpack.c.h.bf16 %v134_v19  ;;  %v135_v32 = vld [vmem:[%s231_s1 + $0x18] sm:$0xff]  }
   0x6   :  { %v63_v14 = vadd.f32 %v119_v4, %v39_v3  ;;  %v64_v21 = vadd.f32 %v120_v7, %v40_v9  ;;  %v43_v22 = vmul.f32 %v115_v18, %v21_v13  ;;  %v66_v27 = vadd.f32 %v124_v17, %v42_v16  ;;  %v24_v35 = vld [vmem:[%s230_s0 + $0x38] sm:$0xff] }
   0x7   :  { %vm73_vm2 = vcmp.ge.f32.partialorder %v65_v26, 0.0  ;;  %v88_v34 = vmul.f32 %v116_v5, %v65_v26  ;;  %v68_v40 = vadd.f32 %v128_v30, %v44_v24  ;;  %v45_v41 = vmul.f32 %v115_v18, %v23_v31 }
   0x8   :  { %vm71_vm0 = vcmp.ge.f32.partialorder %v63_v14, 0.0  ;;  %v86_v25 = vmul.f32 %v116_v5, %v63_v14  ;;  %vm72_vm1 = vcmp.ge.f32.partialorder %v64_v21, 0.0  ;;  %v87_v28 = vmul.f32 %v116_v5, %v64_v21 }
   0x9   :  { %v67_v29 = vadd.f32 %v127_v23, %v43_v22  ;;  %vm74_vm3 = vcmp.ge.f32.partialorder %v66_v27, 0.0  ;;  %v89_v37 = vmul.f32 %v116_v5, %v66_v27  ;;  %v96_v39 = vsel %vm73_vm2, %v65_v26, %v88_v34 }
   0xa   :  { %v94_v33 = vsel %vm71_vm0, %v63_v14, %v86_v25  ;;  %v95_v36 = vsel %vm72_vm1, %v64_v21, %v87_v28  ;;  %v131_v42 = vunpack.c.l.bf16 %v135_v32  ;;  %104 = vst [vmem:[%s234_s4 + $0x10] sm:$0xff] %v96_v39  ;;  %v46_v45 = vmul.f32 %v115_v18, %v24_v35 }
   0xb   :  { %102 = vst [vmem:[%s234_s4] sm:$0xff] %v94_v33  ;;  %vm75_vm4 = vcmp.ge.f32.partialorder %v67_v29, 0.0  ;;  %v90_v38 = vmul.f32 %v116_v5, %v67_v29  ;;  %103 = vst [vmem:[%s234_s4 + $0x8] sm:$0xff] %v95_v36  ;;  %v97_v43 = vsel %vm74_vm3, %v66_v27, %v89_v37  ;;  %v132_v46 = vunpack.c.h.bf16 %v135_v32 }
   0xc   :  { %105 = vst [vmem:[%s234_s4 + $0x18] sm:$0xff] %v97_v43  ;;  %vm76_vm5 = vcmp.ge.f32.partialorder %v68_v40, 0.0  ;;  %v91_v47 = vmul.f32 %v116_v5, %v68_v40  ;;  %v69_v48 = vadd.f32 %v131_v42, %v45_v41 }
   0xd   :  { %v98_v44 = vsel %vm75_vm4, %v67_v29, %v90_v38  ;;  %v70_v49 = vadd.f32 %v132_v46, %v46_v45 }
   0xe   :  { %106 = vst [vmem:[%s234_s4 + $0x20] sm:$0xff] %v98_v44  ;;  %v99_v50 = vsel %vm76_vm5, %v68_v40, %v91_v47  ;;  %vm77_vm6 = vcmp.ge.f32.partialorder %v69_v48, 0.0  ;;  %v92_v51 = vmul.f32 %v116_v5, %v69_v48 }
   0xf   :  { %107 = vst [vmem:[%s234_s4 + $0x28] sm:$0xff] %v99_v50  ;;  %vm78_vm7 = vcmp.ge.f32.partialorder %v70_v49, 0.0  ;;  %v93_v52 = vmul.f32 %v116_v5, %v70_v49 }
  0x10   :  { %v100_v53 = vsel %vm77_vm6, %v69_v48, %v92_v51 }
  0x11   :  { %108 = vst [vmem:[%s234_s4 + $0x30] sm:$0xff] %v100_v53  ;;  %v101_v54 = vsel %vm78_vm7, %v70_v49, %v93_v52 }
  0x12   :  { %109 = vst [vmem:[%s234_s4 + $0x38] sm:$0xff] %v101_v54 }

</bundles_post_ra>
